<compile_context>
chip_gen: v7x
topology: tpu7x:2x2x1
jax: 0.10.0
libtpu: 0.0.40
codegen_flags: <defaults>
</compile_context>

<pallas_src>
import math

import jax
import jax.numpy as jnp
import numpy as np
from jax.experimental import pallas as pl
from jax.experimental.pallas import tpu as pltpu

_NEG_LOG_1E8 = 18.420680743952367   # -log(1e-8)
_PAD_LOGIT = 200.0                  # with target = 1.0 -> exactly zero loss
_LANES = 1024


def _choose_block(C, n, lanes=_LANES, target_elems=1 << 19):
    """Pick (rows, acc_rows, per_elem_pw).

    rows*lanes is the DMA tile; acc_rows*lanes is the accumulator / working
    chunk.  In normal mode (per_elem_pw=False) acc_rows*lanes % C == 0, so the
    pos_weight lane pattern repeats identically per chunk and per tile and a
    single (acc_rows, lanes) pos_weight block serves every tile.
    """
    g = math.gcd(C, lanes)
    r_unit = C // g
    r_unit = (r_unit * 8) // math.gcd(r_unit, 8)      # lcm(., 8)  (f32 sublanes)
    r_unit = (r_unit * 16) // math.gcd(r_unit, 16)    # lcm(., 16) (bf16 packing)
    per_elem_pw = r_unit > 256                        # VMEM guard for awkward C
    if per_elem_pw:
        r_unit = 16
    mult = max(1, target_elems // (r_unit * lanes))
    mult = 1 << (mult.bit_length() - 1)               # power of two
    # Shrink the tile for tiny inputs (still at least one minimal tile).
    need = -(-n // (r_unit * lanes))
    if need < mult:
        mult = 1 << max(0, (need - 1).bit_length())   # smallest pow2 >= need
    acc_mult = max(1, mult // 8)                      # <= 8 chunks per tile
    return r_unit * mult, r_unit * acc_mult, per_elem_pw


def _make_kernel(num_chunks, acc_rows, num_valid_tiles, per_core, has_phantom,
                 per_elem_pw):
    """Build the per-tile loss-sum kernel (all args are Python statics)."""

    def accumulate(logits_ref, targets_ref, pw_ref, acc_ref):
        for k in range(num_chunks):
            sl = pl.ds(k * acc_rows, acc_rows)
            x = logits_ref[sl, :].astype(jnp.float32)   # (acc_rows, lanes)
            t = targets_ref[sl, :].astype(jnp.float32)
            pwm1 = pw_ref[sl, :] if per_elem_pw else pw_ref[...]
            one_m_t = 1.0 - t

            # Numerically stable softplus pieces (EUP: exp + log1p):
            #   sp_pos = -log(sigmoid(x)),  sp_neg = -log(1 - sigmoid(x))
            e = jnp.exp(-jnp.abs(x))
            log1p_e = jnp.log1p(e)
            sp_pos = jnp.maximum(-x, 0.0) + log1p_e
            sp_neg = jnp.maximum(x, 0.0) + log1p_e

            a = t * sp_pos                               # shared with wbce/bce
            bce = a + one_m_t * sp_neg
            acc_ref[0] += bce + pwm1 * a                 # weighted BCE

            pt = jnp.exp(-bce)                           # exact for soft targets
            om_pt = 1.0 - pt
            acc_ref[1] += om_pt * om_pt * bce            # focal (gamma = 2)

            xs_pos = jnp.exp(-sp_pos)                    # sigmoid(x)
            # log(clamp(sigmoid, 1e-8)) == -min(softplus, -log 1e-8)
            log_xs_pos = -jnp.minimum(sp_pos, _NEG_LOG_1E8)
            log_xs_neg = -jnp.minimum(sp_neg, _NEG_LOG_1E8)
            xp2 = xs_pos * xs_pos
            acc_ref[2] += -(t * log_xs_pos * (1.0 - xs_pos)
                            + one_m_t * log_xs_neg * (xp2 * xp2))  # asymmetric

    def kernel(logits_ref, targets_ref, pw_ref, out_ref, acc_ref):
        c = pl.program_id(0)   # core / parallel axis
        i = pl.program_id(1)   # reduction axis (tiles per core)

        @pl.when(i == 0)
        def _():
            acc_ref[...] = jnp.zeros_like(acc_ref)

        if has_phantom:
            @pl.when(c * per_core + i < num_valid_tiles)
            def _():
                accumulate(logits_ref, targets_ref, pw_ref, acc_ref)
        else:
            accumulate(logits_ref, targets_ref, pw_ref, acc_ref)

        @pl.when(i == pl.num_programs(1) - 1)
        def _():
            out_ref[0, 0, :, :] = jnp.full((8, 128), jnp.sum(acc_ref[0]), jnp.float32)
            out_ref[0, 1, :, :] = jnp.full((8, 128), jnp.sum(acc_ref[1]), jnp.float32)
            out_ref[0, 2, :, :] = jnp.full((8, 128), jnp.sum(acc_ref[2]), jnp.float32)

    return kernel


def _loss_sums_jax(x, t, pw):
    """Plain-JAX sums of (wbce, focal, asl) for a small flat tail."""
    x = x.astype(jnp.float32)
    t = t.astype(jnp.float32)
    log1p_e = jnp.log1p(jnp.exp(-jnp.abs(x)))
    sp_pos = jnp.maximum(-x, 0.0) + log1p_e
    sp_neg = jnp.maximum(x, 0.0) + log1p_e
    a = t * sp_pos
    bce = a + (1.0 - t) * sp_neg
    wbce = bce + (pw - 1.0) * a
    pt = jnp.exp(-bce)
    focal = (1.0 - pt) ** 2 * bce
    xs_pos = jnp.exp(-sp_pos)
    lxp = -jnp.minimum(sp_pos, _NEG_LOG_1E8)
    lxn = -jnp.minimum(sp_neg, _NEG_LOG_1E8)
    asl = -(t * lxp * (1.0 - xs_pos) + (1.0 - t) * lxn * xs_pos ** 4)
    return jnp.stack([wbce.sum(), focal.sum(), asl.sum()])


def dynamic_weighted_loss(logits, targets, pos_weight, lambdas,
                          *, input_dtype=jnp.bfloat16):
    """Forward pass of DynamicWeightedLoss.

    logits, targets : (B, C) float
    pos_weight      : (C,)   float  (ones if class_weights is None)
    lambdas         : (3,)   float  (lambda_wbce, lambda_focal, lambda_asl)
    Returns (total_loss, {'wbce':..., 'focal':..., 'asl':...}).
    """
    B, C = logits.shape
    n = B * C
    lanes = _LANES

    rows, acc_rows, per_elem_pw = _choose_block(C, n)
    tile_elems = rows * lanes
    num_chunks = rows // acc_rows

    in_dt = logits.dtype if input_dtype is None else input_dtype
    flat_x = logits.reshape(-1).astype(in_dt)
    flat_t = targets.reshape(-1).astype(in_dt)

    num_full = n // tile_elems
    if num_full == 0:
        # Tiny input: pad to one tile with values whose loss is exactly zero
        # (logit=+200, target=1) -> no in-kernel masking needed.
        pad = tile_elems - n
        flat_x = jnp.pad(flat_x, (0, pad), constant_values=_PAD_LOGIT)
        flat_t = jnp.pad(flat_t, (0, pad), constant_values=1.0)
        num_full = 1
        main = tile_elems
        tail_n = 0
    else:
        main = num_full * tile_elems
        tail_n = n - main

    main_x = flat_x[:main].reshape(main // lanes, lanes)
    main_t = flat_t[:main].reshape(main // lanes, lanes)

    # pos_weight - 1 operand.
    pw_f32 = pos_weight.astype(jnp.float32)
    per_core = -(-num_full // 2)
    has_phantom = (2 * per_core) != num_full

    def data_index_map(c, i):
        return (jnp.minimum(c * per_core + i, num_full - 1), 0)

    if per_elem_pw:
        # Awkward C: per-element pos_weight, blocked exactly like the data.
        reps = -(-main // C)
        pw_m1 = jnp.tile(pw_f32 - 1.0, reps)[:main].reshape(main // lanes, lanes)
        pw_spec = pl.BlockSpec((rows, lanes), data_index_map)
        pw_block_rows = rows
    else:
        # One constant (acc_rows, lanes) block; pattern repeats per chunk/tile.
        reps = (acc_rows * lanes) // C
        pw_m1 = jnp.tile(pw_f32 - 1.0, reps).reshape(acc_rows, lanes)
        pw_spec = pl.BlockSpec((acc_rows, lanes), lambda c, i: (0, 0))
        pw_block_rows = acc_rows

    # VMEM budget: 2 inputs x 2 buffers + pw + accumulator + output block.
    itemsize = jnp.dtype(in_dt).itemsize
    footprint = (2 * 2 * rows * lanes * itemsize
                 + 2 * pw_block_rows * lanes * 4
                 + 3 * acc_rows * lanes * 4
                 + 2 * 3 * 8 * 128 * 4)
    vmem_limit = int(min(56 << 20, max(32 << 20, 2 * footprint)))

    kernel = _make_kernel(num_chunks, acc_rows, num_full, per_core,
                          has_phantom, per_elem_pw)

    out = pl.pallas_call(
        kernel,
        out_shape=jax.ShapeDtypeStruct((2, 3, 8, 128), jnp.float32),
        grid_spec=pltpu.PrefetchScalarGridSpec(
            num_scalar_prefetch=0,
            grid=(2, per_core),
            in_specs=[
                pl.BlockSpec((rows, lanes), data_index_map),
                pl.BlockSpec((rows, lanes), data_index_map),
                pw_spec,
            ],
            out_specs=pl.BlockSpec((1, 3, 8, 128), lambda c, i: (c, 0, 0, 0)),
            scratch_shapes=[pltpu.VMEM((3, acc_rows, lanes), jnp.float32)],
        ),
        compiler_params=pltpu.CompilerParams(
            dimension_semantics=("parallel", "arbitrary"),
            vmem_limit_bytes=vmem_limit,
        ),
    )(main_x, main_t, pw_m1)

    sums = out[:, :, 0, 0].sum(axis=0)        # (3,): add the two core partials

    if tail_n > 0:
        # Small ragged tail (< one tile): reduce in plain JAX, no pad copy.
        tail_x = flat_x[main:]
        tail_t = flat_t[main:]
        pw_tail = jnp.take(pw_f32, jnp.arange(main, n, dtype=jnp.int32) % C)
        sums = sums + _loss_sums_jax(tail_x, tail_t, pw_tail)

    inv_n = 1.0 / float(n)
    wbce_loss = sums[0] * inv_n
    focal_loss = sums[1] * inv_n
    asl_loss = sums[2] * inv_n

    weights = jax.nn.softmax(lambdas.astype(jnp.float32))
    total = (weights[0] * wbce_loss + weights[1] * focal_loss
             + weights[2] * asl_loss)
    return total, {"wbce": wbce_loss, "focal": focal_loss, "asl": asl_loss}


def _reference(logits, targets, pos_weight, lambdas):
    """Pure-JAX reference mirroring the torch forward exactly."""
    x = logits.astype(jnp.float32)
    t = targets.astype(jnp.float32)
    pw = pos_weight.astype(jnp.float32)
    log1p_term = jnp.log1p(jnp.exp(-jnp.abs(x)))
    sp_pos = jnp.maximum(-x, 0.0) + log1p_term
    sp_neg = jnp.maximum(x, 0.0) + log1p_term
    wbce = jnp.mean(pw[None, :] * t * sp_pos + (1.0 - t) * sp_neg)
    bce = t * sp_pos + (1.0 - t) * sp_neg
    pt = jnp.exp(-bce)
    focal = jnp.mean((1.0 - pt) ** 2 * bce)
    xs_pos = jax.nn.sigmoid(x)
    xs_neg = 1.0 - xs_pos
    los_pos = t * jnp.log(jnp.maximum(xs_pos, 1e-8)) * (1.0 - xs_pos)
    los_neg = (1.0 - t) * jnp.log(jnp.maximum(xs_neg, 1e-8)) * xs_pos ** 4
    asl = -jnp.mean(los_pos + los_neg)
    w = jax.nn.softmax(lambdas.astype(jnp.float32))
    total = w[0] * wbce + w[1] * focal + w[2] * asl
    return total, {"wbce": wbce, "focal": focal, "asl": asl}


if __name__ == "__main__":
    num_classes = 4
    B = 16

    key = jax.random.PRNGKey(0)
    k1, k2 = jax.random.split(key)
    logits = jax.random.normal(k1, (B, num_classes), dtype=jnp.float32)
    targets = (jax.random.uniform(k2, (B, num_classes)) > 0.5).astype(jnp.float32)

    # Deterministic parameter init matching the torch module's __init__:
    # lambda_wbce = lambda_focal = lambda_asl = 1.0; pos_weight supplied as a
    # deterministic non-uniform vector (class_weights case).
    lambdas = jnp.array([1.0, 1.0, 1.0], dtype=jnp.float32)
    pos_weight = 0.5 + 0.25 * jnp.arange(num_classes, dtype=jnp.float32)

    total, loss_dict = dynamic_weighted_loss(logits, targets, pos_weight, lambdas)
    jax.block_until_ready(total)

    # The kernel consumes bf16-quantized logits/targets; compare against the
    # exact reference evaluated on the same quantized inputs.
    logits_q = logits.astype(jnp.bfloat16).astype(jnp.float32)
    targets_q = targets.astype(jnp.bfloat16).astype(jnp.float32)
    ref_total, ref_dict = _reference(logits_q, targets_q, pos_weight, lambdas)

    np.testing.assert_allclose(np.asarray(total), np.asarray(ref_total),
                               rtol=1e-5, atol=1e-5)
    for name in ("wbce", "focal", "asl"):
        np.testing.assert_allclose(np.asarray(loss_dict[name]),
                                   np.asarray(ref_dict[name]),
                                   rtol=1e-5, atol=1e-5)

    print("KERNEL_OK")
</pallas_src>

<mosaic_0001>
module attributes {stable_mosaic.version = 11 : i64} {
  func.func @kernel(%arg0: i32, %arg1: i32, %arg2: memref<16x1024xbf16, #tpu.memory_space<vmem>>, %arg3: memref<16x1024xbf16, #tpu.memory_space<vmem>>, %arg4: memref<16x1024xf32, #tpu.memory_space<vmem>>, %arg5: memref<1x3x8x128xf32, #tpu.memory_space<vmem>>, %arg6: memref<3x16x1024xf32, #tpu.memory_space<vmem>>) attributes {dimension_semantics = [#tpu.dimension_semantics<parallel>, #tpu.dimension_semantics<arbitrary>], iteration_bounds = array<i64: 2, 1>, scalar_prefetch = 0 : i64, scratch_operands = 1 : i64, tpu.core_type = #tpu.core_type<tc>, window_params = [{transform_indices = @transform_0, window_bounds = array<i64: 16, 1024>}, {transform_indices = @transform_1, window_bounds = array<i64: 16, 1024>}, {pipeline_mode = #tpu.pipeline_mode<synchronous>, transform_indices = @transform_2, window_bounds = array<i64: 16, 1024>}, {transform_indices = @transform_3, window_bounds = array<i64: 1, 3, 8, 128>}]} {
    %c0_i32 = arith.constant 0 : i32
    %0 = arith.cmpi eq, %arg1, %c0_i32 : i32
    %1 = arith.extui %0 : i1 to i32
    %c0_i32_0 = arith.constant 0 : i32
    %2 = arith.cmpi ne, %1, %c0_i32_0 : i32
    scf.if %2 {
      %cst = arith.constant 0.000000e+00 : f32
      %11 = vector.broadcast %cst : f32 to vector<3x16x1024xf32>
      %c0 = arith.constant 0 : index
      %c0_5 = arith.constant 0 : index
      %c0_6 = arith.constant 0 : index
      %12 = vector.load %arg6[%c0, %c0_5, %c0_6] : memref<3x16x1024xf32, #tpu.memory_space<vmem>>, vector<3x16x1024xf32>
      tpu.vector_store %arg6[%c0, %c0_5, %c0_6], %11 {strides = array<i32>} : memref<3x16x1024xf32, #tpu.memory_space<vmem>>, vector<3x16x1024xf32>,
    } else {
    }
    %c1_i32 = arith.constant 1 : i32
    %3 = arith.muli %arg0, %c1_i32 : i32
    %4 = arith.addi %3, %arg1 : i32
    %c1_i32_1 = arith.constant 1 : i32
    %5 = arith.cmpi slt, %4, %c1_i32_1 : i32
    %6 = arith.extui %5 : i1 to i32
    %c0_i32_2 = arith.constant 0 : i32
    %7 = arith.cmpi ne, %6, %c0_i32_2 : i32
    scf.if %7 {
      %c0 = arith.constant 0 : index
      %c0_5 = arith.constant 0 : index
      %11 = vector.load %arg2[%c0, %c0_5] : memref<16x1024xbf16, #tpu.memory_space<vmem>>, vector<16x1024xbf16>
      %12 = arith.extf %11 : vector<16x1024xbf16> to vector<16x1024xf32>
      %c0_6 = arith.constant 0 : index
      %c0_7 = arith.constant 0 : index
      %13 = vector.load %arg3[%c0_6, %c0_7] : memref<16x1024xbf16, #tpu.memory_space<vmem>>, vector<16x1024xbf16>
      %14 = arith.extf %13 : vector<16x1024xbf16> to vector<16x1024xf32>
      %c0_8 = arith.constant 0 : index
      %c0_9 = arith.constant 0 : index
      %15 = vector.load %arg4[%c0_8, %c0_9] : memref<16x1024xf32, #tpu.memory_space<vmem>>, vector<16x1024xf32>
      %cst = arith.constant 1.000000e+00 : f32
      %16 = vector.broadcast %cst : f32 to vector<16x1024xf32>
      %17 = arith.subf %16, %14 : vector<16x1024xf32>
      %18 = math.absf %12 : vector<16x1024xf32>
      %cst_10 = arith.constant 0.000000e+00 : f32
      %19 = vector.broadcast %cst_10 : f32 to vector<16x1024xf32>
      %20 = arith.subf %19, %18 : vector<16x1024xf32>
      %21 = math.exp %20 : vector<16x1024xf32>
      %22 = math.log1p %21 : vector<16x1024xf32>
      %cst_11 = arith.constant 0.000000e+00 : f32
      %23 = vector.broadcast %cst_11 : f32 to vector<16x1024xf32>
      %24 = arith.subf %23, %12 : vector<16x1024xf32>
      %cst_12 = arith.constant 0.000000e+00 : f32
      %25 = vector.broadcast %cst_12 : f32 to vector<16x1024xf32>
      %26 = arith.maximumf %24, %25 : vector<16x1024xf32>
      %27 = arith.addf %26, %22 : vector<16x1024xf32>
      %cst_13 = arith.constant 0.000000e+00 : f32
      %28 = vector.broadcast %cst_13 : f32 to vector<16x1024xf32>
      %29 = arith.maximumf %12, %28 : vector<16x1024xf32>
      %30 = arith.addf %29, %22 : vector<16x1024xf32>
      %31 = arith.mulf %14, %27 : vector<16x1024xf32>
      %32 = arith.mulf %17, %30 : vector<16x1024xf32>
      %33 = arith.addf %31, %32 : vector<16x1024xf32>
      %c0_14 = arith.constant 0 : index
      %c0_15 = arith.constant 0 : index
      %c0_16 = arith.constant 0 : index
      %34 = vector.load %arg6[%c0_14, %c0_15, %c0_16] : memref<3x16x1024xf32, #tpu.memory_space<vmem>>, vector<1x16x1024xf32>
      %35 = vector.shape_cast %34 : vector<1x16x1024xf32> to vector<16x1024xf32>
      %36 = arith.mulf %15, %31 : vector<16x1024xf32>
      %37 = arith.addf %33, %36 : vector<16x1024xf32>
      %38 = arith.addf %35, %37 : vector<16x1024xf32>
      %c0_17 = arith.constant 0 : index
      %c0_18 = arith.constant 0 : index
      %c0_19 = arith.constant 0 : index
      %39 = vector.load %arg6[%c0_17, %c0_18, %c0_19] : memref<3x16x1024xf32, #tpu.memory_space<vmem>>, vector<1x16x1024xf32>
      %40 = vector.shape_cast %39 : vector<1x16x1024xf32> to vector<16x1024xf32>
      %41 = vector.shape_cast %38 : vector<16x1024xf32> to vector<1x16x1024xf32>
      tpu.vector_store %arg6[%c0_17, %c0_18, %c0_19], %41 {strides = array<i32>} : memref<3x16x1024xf32, #tpu.memory_space<vmem>>, vector<1x16x1024xf32>,
      %cst_20 = arith.constant 0.000000e+00 : f32
      %42 = vector.broadcast %cst_20 : f32 to vector<16x1024xf32>
      %43 = arith.subf %42, %33 : vector<16x1024xf32>
      %44 = math.exp %43 : vector<16x1024xf32>
      %cst_21 = arith.constant 1.000000e+00 : f32
      %45 = vector.broadcast %cst_21 : f32 to vector<16x1024xf32>
      %46 = arith.subf %45, %44 : vector<16x1024xf32>
      %c1 = arith.constant 1 : index
      %c0_22 = arith.constant 0 : index
      %c0_23 = arith.constant 0 : index
      %47 = vector.load %arg6[%c1, %c0_22, %c0_23] : memref<3x16x1024xf32, #tpu.memory_space<vmem>>, vector<1x16x1024xf32>
      %48 = vector.shape_cast %47 : vector<1x16x1024xf32> to vector<16x1024xf32>
      %49 = arith.mulf %46, %46 : vector<16x1024xf32>
      %50 = arith.mulf %49, %33 : vector<16x1024xf32>
      %51 = arith.addf %48, %50 : vector<16x1024xf32>
      %c1_24 = arith.constant 1 : index
      %c0_25 = arith.constant 0 : index
      %c0_26 = arith.constant 0 : index
      %52 = vector.load %arg6[%c1_24, %c0_25, %c0_26] : memref<3x16x1024xf32, #tpu.memory_space<vmem>>, vector<1x16x1024xf32>
      %53 = vector.shape_cast %52 : vector<1x16x1024xf32> to vector<16x1024xf32>
      %54 = vector.shape_cast %51 : vector<16x1024xf32> to vector<1x16x1024xf32>
      tpu.vector_store %arg6[%c1_24, %c0_25, %c0_26], %54 {strides = array<i32>} : memref<3x16x1024xf32, #tpu.memory_space<vmem>>, vector<1x16x1024xf32>,
      %cst_27 = arith.constant 0.000000e+00 : f32
      %55 = vector.broadcast %cst_27 : f32 to vector<16x1024xf32>
      %56 = arith.subf %55, %27 : vector<16x1024xf32>
      %57 = math.exp %56 : vector<16x1024xf32>
      %cst_28 = arith.constant 18.420681 : f32
      %58 = vector.broadcast %cst_28 : f32 to vector<16x1024xf32>
      %59 = arith.minimumf %27, %58 : vector<16x1024xf32>
      %cst_29 = arith.constant 0.000000e+00 : f32
      %60 = vector.broadcast %cst_29 : f32 to vector<16x1024xf32>
      %61 = arith.subf %60, %59 : vector<16x1024xf32>
      %cst_30 = arith.constant 18.420681 : f32
      %62 = vector.broadcast %cst_30 : f32 to vector<16x1024xf32>
      %63 = arith.minimumf %30, %62 : vector<16x1024xf32>
      %cst_31 = arith.constant 0.000000e+00 : f32
      %64 = vector.broadcast %cst_31 : f32 to vector<16x1024xf32>
      %65 = arith.subf %64, %63 : vector<16x1024xf32>
      %66 = arith.mulf %57, %57 : vector<16x1024xf32>
      %c2 = arith.constant 2 : index
      %c0_32 = arith.constant 0 : index
      %c0_33 = arith.constant 0 : index
      %67 = vector.load %arg6[%c2, %c0_32, %c0_33] : memref<3x16x1024xf32, #tpu.memory_space<vmem>>, vector<1x16x1024xf32>
      %68 = vector.shape_cast %67 : vector<1x16x1024xf32> to vector<16x1024xf32>
      %69 = arith.mulf %14, %61 : vector<16x1024xf32>
      %cst_34 = arith.constant 1.000000e+00 : f32
      %70 = vector.broadcast %cst_34 : f32 to vector<16x1024xf32>
      %71 = arith.subf %70, %57 : vector<16x1024xf32>
      %72 = arith.mulf %69, %71 : vector<16x1024xf32>
      %73 = arith.mulf %17, %65 : vector<16x1024xf32>
      %74 = arith.mulf %66, %66 : vector<16x1024xf32>
      %75 = arith.mulf %73, %74 : vector<16x1024xf32>
      %76 = arith.addf %72, %75 : vector<16x1024xf32>
      %cst_35 = arith.constant 0.000000e+00 : f32
      %77 = vector.broadcast %cst_35 : f32 to vector<16x1024xf32>
      %78 = arith.subf %77, %76 : vector<16x1024xf32>
      %79 = arith.addf %68, %78 : vector<16x1024xf32>
      %c2_36 = arith.constant 2 : index
      %c0_37 = arith.constant 0 : index
      %c0_38 = arith.constant 0 : index
      %80 = vector.load %arg6[%c2_36, %c0_37, %c0_38] : memref<3x16x1024xf32, #tpu.memory_space<vmem>>, vector<1x16x1024xf32>
      %81 = vector.shape_cast %80 : vector<1x16x1024xf32> to vector<16x1024xf32>
      %82 = vector.shape_cast %79 : vector<16x1024xf32> to vector<1x16x1024xf32>
      tpu.vector_store %arg6[%c2_36, %c0_37, %c0_38], %82 {strides = array<i32>} : memref<3x16x1024xf32, #tpu.memory_space<vmem>>, vector<1x16x1024xf32>,
    } else {
    }
    %c0_i32_3 = arith.constant 0 : i32
    %8 = arith.cmpi eq, %arg1, %c0_i32_3 : i32
    %9 = arith.extui %8 : i1 to i32
    %c0_i32_4 = arith.constant 0 : i32
    %10 = arith.cmpi ne, %9, %c0_i32_4 : i32
    scf.if %10 {
      %c0 = arith.constant 0 : index
      %c0_5 = arith.constant 0 : index
      %c0_6 = arith.constant 0 : index
      %11 = vector.load %arg6[%c0, %c0_5, %c0_6] : memref<3x16x1024xf32, #tpu.memory_space<vmem>>, vector<1x16x1024xf32>
      %12 = vector.shape_cast %11 : vector<1x16x1024xf32> to vector<16x1024xf32>
      %13 = vector.shape_cast %12 : vector<16x1024xf32> to vector<1x16x1024xf32>
      %cst = arith.constant dense<0.000000e+00> : vector<1xf32>
      %14 = vector.multi_reduction <add>, %13, %cst [1, 2] : vector<1x16x1024xf32> to vector<1xf32>
      %15 = vector.shape_cast %14 : vector<1xf32> to vector<1x1x1xf32>
      %16 = vector.extract %15[0, 0, 0] : f32 from vector<1x1x1xf32>
      %17 = vector.broadcast %16 : f32 to vector<8x128xf32>
      %c0_7 = arith.constant 0 : index
      %c0_8 = arith.constant 0 : index
      %c0_9 = arith.constant 0 : index
      %c0_10 = arith.constant 0 : index
      %18 = vector.load %arg5[%c0_7, %c0_8, %c0_9, %c0_10] : memref<1x3x8x128xf32, #tpu.memory_space<vmem>>, vector<1x1x8x128xf32>
      %19 = vector.shape_cast %18 : vector<1x1x8x128xf32> to vector<8x128xf32>
      %20 = vector.shape_cast %17 : vector<8x128xf32> to vector<1x1x8x128xf32>
      tpu.vector_store %arg5[%c0_7, %c0_8, %c0_9, %c0_10], %20 {strides = array<i32>} : memref<1x3x8x128xf32, #tpu.memory_space<vmem>>, vector<1x1x8x128xf32>,
      %c1 = arith.constant 1 : index
      %c0_11 = arith.constant 0 : index
      %c0_12 = arith.constant 0 : index
      %21 = vector.load %arg6[%c1, %c0_11, %c0_12] : memref<3x16x1024xf32, #tpu.memory_space<vmem>>, vector<1x16x1024xf32>
      %22 = vector.shape_cast %21 : vector<1x16x1024xf32> to vector<16x1024xf32>
      %23 = vector.shape_cast %22 : vector<16x1024xf32> to vector<1x16x1024xf32>
      %cst_13 = arith.constant dense<0.000000e+00> : vector<1xf32>
      %24 = vector.multi_reduction <add>, %23, %cst_13 [1, 2] : vector<1x16x1024xf32> to vector<1xf32>
      %25 = vector.shape_cast %24 : vector<1xf32> to vector<1x1x1xf32>
      %26 = vector.extract %25[0, 0, 0] : f32 from vector<1x1x1xf32>
      %27 = vector.broadcast %26 : f32 to vector<8x128xf32>
      %c0_14 = arith.constant 0 : index
      %c1_15 = arith.constant 1 : index
      %c0_16 = arith.constant 0 : index
      %c0_17 = arith.constant 0 : index
      %28 = vector.load %arg5[%c0_14, %c1_15, %c0_16, %c0_17] : memref<1x3x8x128xf32, #tpu.memory_space<vmem>>, vector<1x1x8x128xf32>
      %29 = vector.shape_cast %28 : vector<1x1x8x128xf32> to vector<8x128xf32>
      %30 = vector.shape_cast %27 : vector<8x128xf32> to vector<1x1x8x128xf32>
      tpu.vector_store %arg5[%c0_14, %c1_15, %c0_16, %c0_17], %30 {strides = array<i32>} : memref<1x3x8x128xf32, #tpu.memory_space<vmem>>, vector<1x1x8x128xf32>,
      %c2 = arith.constant 2 : index
      %c0_18 = arith.constant 0 : index
      %c0_19 = arith.constant 0 : index
      %31 = vector.load %arg6[%c2, %c0_18, %c0_19] : memref<3x16x1024xf32, #tpu.memory_space<vmem>>, vector<1x16x1024xf32>
      %32 = vector.shape_cast %31 : vector<1x16x1024xf32> to vector<16x1024xf32>
      %33 = vector.shape_cast %32 : vector<16x1024xf32> to vector<1x16x1024xf32>
      %cst_20 = arith.constant dense<0.000000e+00> : vector<1xf32>
      %34 = vector.multi_reduction <add>, %33, %cst_20 [1, 2] : vector<1x16x1024xf32> to vector<1xf32>
      %35 = vector.shape_cast %34 : vector<1xf32> to vector<1x1x1xf32>
      %36 = vector.extract %35[0, 0, 0] : f32 from vector<1x1x1xf32>
      %37 = vector.broadcast %36 : f32 to vector<8x128xf32>
      %c0_21 = arith.constant 0 : index
      %c2_22 = arith.constant 2 : index
      %c0_23 = arith.constant 0 : index
      %c0_24 = arith.constant 0 : index
      %38 = vector.load %arg5[%c0_21, %c2_22, %c0_23, %c0_24] : memref<1x3x8x128xf32, #tpu.memory_space<vmem>>, vector<1x1x8x128xf32>
      %39 = vector.shape_cast %38 : vector<1x1x8x128xf32> to vector<8x128xf32>
      %40 = vector.shape_cast %37 : vector<8x128xf32> to vector<1x1x8x128xf32>
      tpu.vector_store %arg5[%c0_21, %c2_22, %c0_23, %c0_24], %40 {strides = array<i32>} : memref<1x3x8x128xf32, #tpu.memory_space<vmem>>, vector<1x1x8x128xf32>,
    } else {
    }
    return
  }
  func.func @transform_0(%arg0: i32, %arg1: i32) -> (i32, i32) {
    %c1_i32 = arith.constant 1 : i32
    %0 = arith.muli %arg0, %c1_i32 : i32
    %1 = arith.addi %0, %arg1 : i32
    %c0_i32 = arith.constant 0 : i32
    %2 = arith.minsi %1, %c0_i32 : i32
    %c0_i32_0 = arith.constant 0 : i32
    %c0_i32_1 = arith.constant 0 : i32
    return %2, %c0_i32_0 : i32, i32
  }
  func.func @transform_1(%arg0: i32, %arg1: i32) -> (i32, i32) {
    %c1_i32 = arith.constant 1 : i32
    %0 = arith.muli %arg0, %c1_i32 : i32
    %1 = arith.addi %0, %arg1 : i32
    %c0_i32 = arith.constant 0 : i32
    %2 = arith.minsi %1, %c0_i32 : i32
    %c0_i32_0 = arith.constant 0 : i32
    %c0_i32_1 = arith.constant 0 : i32
    return %2, %c0_i32_0 : i32, i32
  }
  func.func @transform_2(%arg0: i32, %arg1: i32) -> (i32, i32) {
    %c0_i32 = arith.constant 0 : i32
    %c0_i32_0 = arith.constant 0 : i32
    %c0_i32_1 = arith.constant 0 : i32
    return %c0_i32, %c0_i32_0 : i32, i32
  }
  func.func @transform_3(%arg0: i32, %arg1: i32) -> (i32, i32, i32, i32) {
    %c0_i32 = arith.constant 0 : i32
    %c0_i32_0 = arith.constant 0 : i32
    %c0_i32_1 = arith.constant 0 : i32
    %c0_i32_2 = arith.constant 0 : i32
    return %arg0, %c0_i32, %c0_i32_0, %c0_i32_1 : i32, i32, i32, i32
  }
}

</mosaic_0001>

<bundles_post_ra>
// kernel: tpu_custom_call.1
= control target key start
LH: loop header
LB: loop body
LE: loop exit
PB: predicated region body
PF: predicated region fallthrough
CT: control target
= control target key end

     0   :  { %s3068_s0 = inlined_call_operand.hbm [shape: bf16[16,1024], index: 0, kind: input, shape index: {}]   ;;  %s3069_s1 = inlined_call_operand.hbm [shape: bf16[16,1024], index: 1, kind: input, shape index: {}]   ;;  %s3070_s2 = inlined_call_operand.hbm [shape: f32[16,1024], index: 2, kind: input, shape index: {}]   ;;  %s3071_s3 = inlined_call_operand.hbm [shape: f32[2,3,8,128], index: 3, kind: output, shape index: {}]  }
   0x1   :  { %3139 = sst [smem:[#allocation60_spill]] %s3070_s2 }
   0x2   :  { %8 = vsyncpa [#allocation4], 0 }
   0x3   :  { %10 = vsyncpa [#allocation4 + $0x1], 0 }
   0x4   :  { %11 = vsyncpa [#allocation7], 0 }
   0x5   :  { %13 = vsyncpa [#allocation7 + $0x1], 0 }
   0x6   :  { %14 = vsyncpa [#allocation5], 0 }
   0x7   :  { %16 = vsyncpa [#allocation5 + $0x1], 0  ;;  %s2050_s12 = smov 0   ;;  %s2052_s13 = smov 0  }
   0x8   :  { %s2054_s14 = smov 0   ;;  %s2056_s15 = smov 0  }
   0x9   :  { %s2058_s16 = smov 0   ;;  %s2060_s17 = smov 0  }
   0xa   :  { %s2062_s18 = smov 0   ;;  %s2064_s19 = smov 0  }
   0xb LB: > { %s2089_s20 = sadd.s32 4294967295, %s2017_s19   ;;  %s1547_s21 = sadd.s32 4294967294, %s2017_s19   ;;  %s2017_s19 = sphi %s2064_s19, %s22_s19   ;;  %s2013_s18 = sphi %s2062_s18, %s3322_s18   ;;  %s2009_s17 = sphi %s2060_s17, %s3321_s17   ;;  %s2005_s16 = sphi %s2058_s16, %s3058_s16   ;;  %s2001_s15 = sphi %s2056_s15, %s3320_s15   ;;  %s1997_s14 = sphi %s2054_s14, %s3319_s14   ;;  %s1993_s13 = sphi %s2052_s13, %s3318_s13   ;;  %s1989_s12 = sphi %s2050_s12, %s3317_s12  }
   0xc   : > { %p60_p0 = scmp.ne.s32.totalorder %s2005_s16, %s2001_s15  ;;  %p3072_p1 = scmp.eq.s32.totalorder %s2089_s20, 0 }
   0xd   : > { %s126_s22 = sadd.s32 1, %s1997_s14  ;;  %p136_p2 = scmp.ne.s32.totalorder %s1997_s14, %s1993_s13 }
   0xe   : > { %p2099_p3 = por %p3072_p1, %p60_p0  ;;  %p137_p4 = scmp.eq.s32.totalorder %s2089_s20, 1 }
   0xf   : > { %p142_p5 = scmp.ne.s32.totalorder %s1993_s13, %s1989_s12  ;;  %p143_p6 = scmp.eq.s32.totalorder %s1547_s21, 1 }
  0x10   : > { %s3140_s23 = scalar_select %p2099_p3, 1, 0 }
  0x11   : > { %p2106_p7 = por %p137_p4, %p136_p2  ;;  %p1548_p8 = scmp.ge.s32.totalorder %s2017_s19, 1 }
  0x12   : > { %p2111_p9 = por %p143_p6, %p142_p5  ;;  %p150_p10 = scmp.lt.s32.totalorder %s2017_s19, 3 }
  0x13   : > { %s3141_s24 = scalar_select %p2106_p7, 1, 0 }
  0x14   : > { %s3142_s25 = scalar_select %p2111_p9, 1, 0 }
  0x15   : > { %p2116_p11 = pnand %p1548_p8, %p150_p10  ;;  %s2019_s27 = smov [#allocation8]  }
  0x16   : > { %s162_s28 = sshll.u32 %s2019_s27, 4  ;;  %s34_s30 = sadd.s32 1, %s2013_s18  ;;  %s163_s28 = int_to_ptr.vmem [resolvable:$true] %s162_s28 }
  0x17   : > { %s3143_s26 = scalar_select %p2116_p11, 1, 0 }
  0x18   : > { %p1591_p12 = pneg %p2116_p11  ;;  %s3145_s2 = sld [smem:[#allocation60_spill]] }
  0x1a   : > { %p2125_p0 = pnand %p1591_p12, %p3072_p1 }
  0x1c   : > { %p1820_p4 = pneg %p2125_p0 }
  0x1e   : > { %s1818_s6 = scalar_lea.hbm %s3145_s2, 2048 }
  0x1f   : > { %p1819_p2 = scmp.ne.s32.totalorder %s3145_s2, %s1818_s6  ;;  %p1825_p8 = scmp.lt.u32.totalorder %s1818_s6, %s3145_s2 }
  0x21   : > { %p1821_p5 = pnand %p1820_p4, %p1819_p2 }
  0x23   : > { %p1822_p6 = pneg %p1821_p5 }
  0x25   : > { %p1827_p10 = pnand %p1825_p8, %p1822_p6 }
  0x27   : > { %1830 = shalt.err (!%p1827_p10)
}
  0x28   : > { %s1831_s11 = scalar_lea.vmem %s163_s28, 2048  ;;  %p1839_p9 = scmp.lt.s32.totalorder %s163_s28, %s163_s28 }
  0x29   : > { %p1832_p12 = scmp.ne.s32.totalorder %s163_s28, %s1831_s11  ;;  %p1840_p7 = scmp.lt.s32.totalorder %s1831_s11, %s1831_s11 }
  0x2b   : > { %p1834_p13 = pnand %p1832_p12, %p1820_p4  ;;  %p1841_p3 = por %p1840_p7, %p1839_p9 }
  0x2d   : > { %p1835_p1 = pneg %p1834_p13 }
  0x2f   : > { %p1842_p11 = pnand %p1841_p3, %p1835_p1 }
  0x31   : > { %1845 = shalt.err (!%p1842_p11)
}
  0x32   : > { %s2020_s15 = smov 1024   ;;  %s2021_s21 = smov 64  }
  0x33   : > { %1594 = dma.hbm_to_vmem [thread:$0]  (!%p2125_p0), %s3145_s2, 2048, %s163_s28, [#allocation7], %s2020_s15, %s2020_s15, %s2021_s21  }
  0x34   : > { %p36_p13 = scmp.ge.s32.totalorder %s34_s30, 2  ;;  %p1986_p2 = scmp.ne.s32.totalorder %s2005_s16, 0 }
  0x35   : > { %p55_p1 = scmp.eq.s32.totalorder %s2017_s19, 0  ;;  %p1607_p3 = scmp.lt.s32.totalorder %s2017_s19, 2 }
  0x36   : > { %s3324_s30 = smov (%p36_p13, %s34_s30), 0  ;;  %s2022_s7 = smov [#allocation3]  }
  0x37   : > { %3146 = sst [smem:[#allocation14_spill]] %s3324_s30  ;;  %s123_s5 = ssub.s32 %s2013_s18, %s3324_s30 }
  0x38   : > { %p56_p7 = por %p1986_p2, %p55_p1  ;;  %p124_p9 = scmp.eq.s32.totalorder %s123_s5, 0 }
  0x39   : > { %s191_s8 = sshll.u32 %s2022_s7, 4  ;;  %s1846_s10 = scalar_lea.hbm %s3068_s0, 1024  ;;  %s192_s8 = int_to_ptr.vmem [resolvable:$true] %s191_s8 }
  0x3a   : > { %s2156_s6 = scalar_select %p124_p9, %s1997_s14, %s126_s22  }
  0x3b   : > { %p2158_p11 = pnand %p1607_p3, %p56_p7  ;;  %p1847_p0 = scmp.ne.s32.totalorder %s3068_s0, %s1846_s10 }
  0x3c   : > { %p1853_p8 = scmp.lt.u32.totalorder %s1846_s10, %s1846_s10  ;;  %p1855_p10 = scmp.lt.u32.totalorder %s1846_s10, %s3068_s0 }
  0x3d   : > { %p1848_p4 = pneg %p2158_p11 }
  0x3e   : > { %p1856_p12 = por %p1855_p10, %p1853_p8 }
  0x3f   : > { %p1849_p5 = pnand %p1848_p4, %p1847_p0 }
  0x41   : > { %p1850_p6 = pneg %p1849_p5 }
  0x43   : > { %p1857_p13 = pnand %p1856_p12, %p1850_p6 }
  0x45   : > { %1860 = shalt.err (!%p1857_p13)
}
  0x46   : > { %s1861_s27 = scalar_lea.vmem %s192_s8, 1024  ;;  %s1868_s4 = scalar_lea.vmem %s192_s8, 2048 }
  0x47   : > { %p1862_p2 = scmp.ne.s32.totalorder %s192_s8, %s1861_s27  ;;  %p1869_p7 = scmp.lt.s32.totalorder %s192_s8, %s192_s8 }
  0x48   : > { %p1870_p9 = scmp.lt.s32.totalorder %s1868_s4, %s1861_s27 }
  0x49   : > { %p1864_p1 = pnand %p1862_p2, %p1848_p4 }
  0x4a   : > { %p1871_p0 = por %p1870_p9, %p1869_p7 }
  0x4b   : > { %p1865_p3 = pneg %p1864_p1 }
  0x4d   : > { %p1872_p5 = pnand %p1871_p0, %p1865_p3 }
  0x4f   : > { %1875 = shalt.err (!%p1872_p5)
}
  0x50   : > { %s2023_s5 = smov 512   ;;  %s2024_s7 = smov 32  }
  0x51   : > { %1598 = dma.hbm_to_vmem [thread:$0]  (!%p2158_p11), %s3068_s0, 1024, %s192_s8, [#allocation4], %s2023_s5, %s2023_s5, %s2024_s7  }
  0x52   : > { %s2025_s10 = smov [#allocation6]   ;;  %s201_s15 = sand.u32 1, %s2017_s19  }
  0x53   : > { %s216_s11 = sshll.u32 %s2025_s10, 4  ;;  %s202_s22 = scalar_lea.sflag [#allocation7], %s201_s15  ;;  %s217_s11 = int_to_ptr.vmem [resolvable:$true] %s216_s11 }
  0x54   : > { %s1876_s4 = scalar_lea.hbm %s3069_s1, 1024 }
  0x55   : > { %p1877_p6 = scmp.ne.s32.totalorder %s3069_s1, %s1876_s4  ;;  %p1883_p12 = scmp.lt.u32.totalorder %s1876_s4, %s1876_s4 }
  0x56   : > { %p1885_p13 = scmp.lt.u32.totalorder %s1876_s4, %s3069_s1 }
  0x57   : > { %p1879_p8 = pnand %p1877_p6, %p1848_p4 }
  0x58   : > { %p1886_p2 = por %p1885_p13, %p1883_p12 }
  0x59   : > { %p1880_p10 = pneg %p1879_p8 }
  0x5b   : > { %p1887_p1 = pnand %p1886_p2, %p1880_p10 }
  0x5d   : > { %1890 = shalt.err (!%p1887_p1)
}
  0x5e   : > { %s1891_s9 = scalar_lea.vmem %s217_s11, 1024  ;;  %s1898_s2 = scalar_lea.vmem %s217_s11, 2048 }
  0x5f   : > { %p1892_p3 = scmp.ne.s32.totalorder %s217_s11, %s1891_s9  ;;  %p1899_p0 = scmp.lt.s32.totalorder %s217_s11, %s217_s11 }
  0x60   : > { %p1900_p5 = scmp.lt.s32.totalorder %s1898_s2, %s1891_s9 }
  0x61   : > { %p1894_p7 = pnand %p1892_p3, %p1848_p4 }
  0x62   : > { %p1901_p6 = por %p1900_p5, %p1899_p0 }
  0x63   : > { %p1895_p9 = pneg %p1894_p7 }
  0x65   : > { %p1902_p8 = pnand %p1901_p6, %p1895_p9 }
  0x67   : > { %1905 = shalt.err (!%p1902_p8)
}
  0x68   : > { %1601 = dma.hbm_to_vmem [thread:$0]  (!%p2158_p11), %s3069_s1, 1024, %s217_s11, %s202_s22, %s2023_s5, %s2023_s5, %s2024_s7  }
  0x69   : > { %p3148_p10 = scmp.ne.s32.totalorder %s3143_s26, 0 }
  0x6a   : > { %s230_s15 = sand.u32 (!%p3148_p10), 1, %s2005_s16   ;;  %p3149_p4 = scmp.ne.s32.totalorder (!%p3148_p10), %s3140_s23, 0 }
  0x6b   : > { %228 = sbr.rel (%p3148_p10) target bundleno = 628 (0x274), region = 32  ;;  %s1560_s21 = sshll.u32 (!%p3148_p10), %s230_s15, 6 }
  0x6c   : > { %s231_s27 = scalar_lea.sflag (!%p3148_p10), [#allocation4], %s230_s15  ;;  %s2214_s4 = scalar_lea.vmem (!%p3148_p10), [#allocation3], %s1560_s21 }
  0x72   : > { %1971 = dma.done.wait (%p3149_p4), %s231_s27, 1024  }
  0x73   : > { %1973 = vsyncadd (%p3149_p4), %s231_s27, 4294966272  ;;  %s239_s29 = sand.u32 1, %s2089_s20   ;;  %s2221_s5 = scalar_lea.vmem [#allocation6], %s1560_s21 }
  0x74   : > { %s240_s28 = scalar_lea.sflag [#allocation7], %s239_s29 }
  0x75   : > { %1975 = dma.done.wait (%p3149_p4), %s240_s28, 1024  }
  0x76   : > { %1977 = vsyncadd (%p3149_p4), %s240_s28, 4294966272  ;;  %p3150_p11 = scmp.eq.s32.totalorder %s2089_s20, 0 }
  0x78   : > { %1979 = dma.done.wait (%p3150_p11), [#allocation7], 2048   ;;  %p3151_p12 = pmov %p3150_p11 }
  0x79   : > { %s272_s26 = sand.u32 1, %s1993_s13   ;;  %v2026_v0 = vmov 0.0   ;;  %p1563_p13 = scmp.ge.s32.totalorder %s2009_s17, 1 }
  0x7a   : > { %1981 = vsyncadd (%p3151_p12), [#allocation7], 4294965248  ;;  %s2234_s7 = smul.u32 24, %s272_s26  ;;  %287 = vst [vmem:[#allocation2] sm:$0xff] %v2026_v0 }
  0x7b   : > { %288 = vst [vmem:[#allocation2 + $0x8] sm:$0xff] %v2026_v0  ;;  %289 = vst [vmem:[#allocation2 + $0x10] sm:$0xff] %v2026_v0 }
  0x7c   : > { %290 = vst [vmem:[#allocation2 + $0x18] sm:$0xff] %v2026_v0  ;;  %291 = vst [vmem:[#allocation2 + $0x20] sm:$0xff] %v2026_v0  ;;  %s2237_s20 = scalar_lea.vmem [#allocation9], %s2234_s7 }
  0x7d   : > { %292 = vst [vmem:[#allocation2 + $0x28] sm:$0xff] %v2026_v0  ;;  %293 = vst [vmem:[#allocation2 + $0x30] sm:$0xff] %v2026_v0 }
  0x7e   : > { %294 = vst [vmem:[#allocation2 + $0x38] sm:$0xff] %v2026_v0  ;;  %295 = vst [vmem:[#allocation2 + $0x40] sm:$0xff] %v2026_v0 }
  0x7f   : > { %296 = vst [vmem:[#allocation2 + $0x48] sm:$0xff] %v2026_v0  ;;  %297 = vst [vmem:[#allocation2 + $0x50] sm:$0xff] %v2026_v0 }
  0x80   : > { %298 = vst [vmem:[#allocation2 + $0x58] sm:$0xff] %v2026_v0  ;;  %299 = vst [vmem:[#allocation2 + $0x60] sm:$0xff] %v2026_v0 }
  0x81   : > { %300 = vst [vmem:[#allocation2 + $0x68] sm:$0xff] %v2026_v0  ;;  %301 = vst [vmem:[#allocation2 + $0x70] sm:$0xff] %v2026_v0 }
  0x82   : > { %302 = vst [vmem:[#allocation2 + $0x78] sm:$0xff] %v2026_v0  ;;  %303 = vst [vmem:[#allocation2 + $0x80] sm:$0xff] %v2026_v0 }
  0x83   : > { %304 = vst [vmem:[#allocation2 + $0x88] sm:$0xff] %v2026_v0  ;;  %305 = vst [vmem:[#allocation2 + $0x90] sm:$0xff] %v2026_v0 }
  0x84   : > { %306 = vst [vmem:[#allocation2 + $0x98] sm:$0xff] %v2026_v0  ;;  %307 = vst [vmem:[#allocation2 + $0xa0] sm:$0xff] %v2026_v0 }
  0x85   : > { %308 = vst [vmem:[#allocation2 + $0xa8] sm:$0xff] %v2026_v0  ;;  %309 = vst [vmem:[#allocation2 + $0xb0] sm:$0xff] %v2026_v0 }
  0x86   : > { %310 = vst [vmem:[#allocation2 + $0xb8] sm:$0xff] %v2026_v0  ;;  %311 = vst [vmem:[#allocation2 + $0xc0] sm:$0xff] %v2026_v0 }
  0x87   : > { %312 = vst [vmem:[#allocation2 + $0xc8] sm:$0xff] %v2026_v0  ;;  %313 = vst [vmem:[#allocation2 + $0xd0] sm:$0xff] %v2026_v0 }
  0x88   : > { %314 = vst [vmem:[#allocation2 + $0xd8] sm:$0xff] %v2026_v0  ;;  %315 = vst [vmem:[#allocation2 + $0xe0] sm:$0xff] %v2026_v0 }
  0x89   : > { %316 = vst [vmem:[#allocation2 + $0xe8] sm:$0xff] %v2026_v0  ;;  %317 = vst [vmem:[#allocation2 + $0xf0] sm:$0xff] %v2026_v0 }
  0x8a   : > { %318 = vst [vmem:[#allocation2 + $0xf8] sm:$0xff] %v2026_v0  ;;  %319 = vst [vmem:[#allocation2 + $0x100] sm:$0xff] %v2026_v0 }
  0x8b   : > { %320 = vst [vmem:[#allocation2 + $0x108] sm:$0xff] %v2026_v0  ;;  %321 = vst [vmem:[#allocation2 + $0x110] sm:$0xff] %v2026_v0 }
  0x8c   : > { %322 = vst [vmem:[#allocation2 + $0x118] sm:$0xff] %v2026_v0  ;;  %323 = vst [vmem:[#allocation2 + $0x120] sm:$0xff] %v2026_v0  ;;  %339 = sbr.rel (%p1563_p13) target bundleno = 370 (0x172), region = 52 }
  0x8d   : > { %324 = vst [vmem:[#allocation2 + $0x128] sm:$0xff] %v2026_v0  ;;  %325 = vst [vmem:[#allocation2 + $0x130] sm:$0xff] %v2026_v0 }
  0x8e   : > { %326 = vst [vmem:[#allocation2 + $0x138] sm:$0xff] %v2026_v0  ;;  %327 = vst [vmem:[#allocation2 + $0x140] sm:$0xff] %v2026_v0 }
  0x8f   : > { %328 = vst [vmem:[#allocation2 + $0x148] sm:$0xff] %v2026_v0  ;;  %329 = vst [vmem:[#allocation2 + $0x150] sm:$0xff] %v2026_v0 }
  0x90   : > { %330 = vst [vmem:[#allocation2 + $0x158] sm:$0xff] %v2026_v0  ;;  %331 = vst [vmem:[#allocation2 + $0x160] sm:$0xff] %v2026_v0 }
  0x91   : > { %332 = vst [vmem:[#allocation2 + $0x168] sm:$0xff] %v2026_v0  ;;  %333 = vst [vmem:[#allocation2 + $0x170] sm:$0xff] %v2026_v0 }
  0x92   : > { %334 = vst [vmem:[#allocation2 + $0x178] sm:$0xff] %v2026_v0 }
  0x93   : > { %v340_v1 = vld [vmem:[%s2214_s4] sm:$0xff]  ;;  %v341_v7 = vld [vmem:[%s2214_s4 + $0x8] sm:$0xff]  ;;  %v342_v24 = vld [vmem:[%s2214_s4 + $0x10] sm:$0xff] }
  0x94   : > { %v364_v2 = vld [vmem:[%s2221_s5] sm:$0xff]  ;;  %v2242_v3 = vunpack.c.l.bf16 %v340_v1  ;;  %v2246_v5 = vunpack.c.h.bf16 %v340_v1  ;;  %v365_v9 = vld [vmem:[%s2221_s5 + $0x8] sm:$0xff]  ;;  %v2258_v16 = vunpack.c.l.bf16 %v341_v7  ;;  %v2263_v20 = vunpack.c.h.bf16 %v341_v7  ;;  %v366_v35 = vld [vmem:[%s2221_s5 + $0x10] sm:$0xff] }
  0x95   : > { %v2244_v4 = vunpack.c.l.bf16 %v364_v2  ;;  %v2248_v6 = vunpack.c.h.bf16 %v364_v2  ;;  %v2261_v19 = vunpack.c.l.bf16 %v365_v9  ;;  %v2270_v27 = vunpack.c.h.bf16 %v365_v9  ;;  %v343_v43 = vld [vmem:[%s2214_s4 + $0x18] sm:$0xff] }
  0x96   : > { %v420_v8 = vand.u32 2147483647, %v2242_v3  ;;  %v628_v11 = vsub.f32 0.0, %v2242_v3  ;;  %v421_v12 = vand.u32 2147483647, %v2246_v5  ;;  %v676_v14 = vmax.f32 %v2242_v3, 0.0 }
  0x97   : > { %3152 = vst [vmem:[#allocation15_spill] sm:$0xff] %v2248_v6  ;;  %v3077_v10 = vsub.f32 1.0, %v2244_v4  ;;  %v629_v15 = vsub.f32 0.0, %v2246_v5  ;;  %v3078_v17 = vsub.f32 1.0, %v2248_v6  ;;  %3153 = vst [vmem:[#allocation16_spill] sm:$0xff] %v2261_v19  ;;  %v677_v22 = vmax.f32 %v2246_v5, 0.0 }
  0x98   : > { %v436_v13 = vsub.f32 0.0, %v420_v8  ;;  %v437_v18 = vsub.f32 0.0, %v421_v12  ;;  %v422_v23 = vand.u32 2147483647, %v2258_v16  ;;  %v2268_v25 = vmax.f32 %v628_v11, 0.0  ;;  %3154 = vst [vmem:[#allocation17_spill] sm:$0xff] %v2270_v27 }
  0x99   : > { %v423_v28 = vand.u32 2147483647, %v2263_v20  ;;  %v2273_v29 = vmax.f32 %v629_v15, 0.0  ;;  %v630_v31 = vsub.f32 0.0, %v2258_v16  ;;  %v3079_v32 = vsub.f32 1.0, %v2261_v19  ;;  %v367_v50 = vld [vmem:[%s2221_s5 + $0x18] sm:$0xff] }
  0x9a   : > { %v452_v21 = vmul.f32 1.442695, %v436_v13  ;;  %v454_v26 = vmul.f32 1.442695, %v437_v18  ;;  %v438_v30 = vsub.f32 0.0, %v422_v23  ;;  %v2277_v34 = vunpack.c.l.bf16 %v342_v24  ;;  %v2399_v5 = vld [vmem:[%s2214_s4 + $0x28] sm:$0xff] }
  0x9b   : > { %v439_v33 = vsub.f32 0.0, %v423_v28  ;;  %v678_v37 = vmax.f32 %v2258_v16, 0.0  ;;  %v631_v38 = vsub.f32 0.0, %v2263_v20  ;;  %v2282_v39 = vunpack.c.h.bf16 %v342_v24 }
  0x9c   : > { %1690 = vpow2.f32 %v452_v21  ;;  %v456_v36 = vmul.f32 1.442695, %v438_v30  ;;  %v424_v42 = vand.u32 2147483647, %v2277_v34  ;;  %v2287_v44 = vmax.f32 %v630_v31, 0.0 }
  0x9d   : > { %1692 = vpow2.f32 %v454_v26  ;;  %v458_v41 = vmul.f32 1.442695, %v439_v33  ;;  %v2289_v45 = vunpack.c.l.bf16 %v366_v35  ;;  %v425_v46 = vand.u32 2147483647, %v2282_v39 }
  0x9e   : > { %1694 = vpow2.f32 %v456_v36  ;;  %v440_v47 = vsub.f32 0.0, %v424_v42  ;;  %v632_v48 = vsub.f32 0.0, %v2277_v34  ;;  %v2293_v49 = vunpack.c.h.bf16 %v366_v35 }
  0x9f   : > { %3155 = vst [vmem:[#allocation18_spill] sm:$0xff] %v2289_v45  ;;  %1696 = vpow2.f32 %v458_v41  ;;  %v2296_v51 = vmax.f32 %v631_v38, 0.0  ;;  %v679_v52 = vmax.f32 %v2263_v20, 0.0  ;;  %v441_v53 = vsub.f32 0.0, %v425_v46 }
  0xa0   : > { %3156 = vst [vmem:[#allocation19_spill] sm:$0xff] %v2293_v49  ;;  %v2299_v54 = vunpack.c.l.bf16 %v343_v43  ;;  %v460_v55 = vmul.f32 1.442695, %v440_v47  ;;  %v633_v57 = vsub.f32 0.0, %v2282_v39  ;;  %v2303_v58 = vunpack.c.h.bf16 %v343_v43 }
  0xa1   : > { %v462_v60 = vmul.f32 1.442695, %v441_v53  ;;  %v2306_v61 = vunpack.c.l.bf16 %v367_v50  ;;  %v2309_v63 = vmax.f32 %v632_v48, 0.0  ;;  %v2314_v8 = vunpack.c.h.bf16 %v367_v50  ;;  %v344_v48 = vld [vmem:[%s2214_s4 + $0x20] sm:$0xff] }
  0xa2   : > { %v426_v62 = vand.u32 2147483647, %v2299_v54  ;;  %1698 = vpow2.f32 %v460_v55  ;;  %v634_v7 = vsub.f32 0.0, %v2299_v54  ;;  %v427_v9 = vand.u32 2147483647, %v2303_v58 }
  0xa3   : > { %3157 = vst [vmem:[#allocation20_spill] sm:$0xff] %v2306_v61  ;;  %1700 = vpow2.f32 %v462_v60  ;;  %3158 = vst [vmem:[#allocation21_spill] sm:$0xff] %v2314_v8  ;;  %v2317_v15 = vmax.f32 %v633_v57, 0.0  ;;  %v635_v31 = vsub.f32 0.0, %v2303_v58 }
  0xa4   : > { %v442_v26 = vsub.f32 0.0, %v426_v62  ;;  %v2322_v35 = vmax.f32 %v634_v7, 0.0  ;;  %v443_v38 = vsub.f32 0.0, %v427_v9 }
  0xa5   : > { %v2334_v7 = vmax.f32 %v635_v31, 0.0 }
  0xa6   : > { %v1691_v2 = vpop.eup %1690  ;;  %v464_v57 = vmul.f32 1.442695, %v442_v26 }
  0xa7   : > { %v1693_v11 = vpop.eup %1692  ;;  %v484_v12 = vadd.f32 1.0, %v1691_v2  ;;  %v487_v13 = vmul.f32 -0.5, %v1691_v2  ;;  %v490_v28 = vand.u32 2147483647, %v1691_v2 }
  0xa8   : > { %v493_v21 = vadd.f32 1.0, %v1693_v11  ;;  %v496_v23 = vmul.f32 -0.5, %v1693_v11  ;;  %v499_v30 = vand.u32 2147483647, %v1693_v11  ;;  %v1695_v33 = vpop.eup %1694 }
  0xa9   : > { %1702 = vlog2.f32 %v484_v12  ;;  %v1697_v41 = vpop.eup %1696  ;;  %v488_v42 = vadd.f32 1.0, %v487_v13  ;;  %v502_v46 = vadd.f32 1.0, %v1695_v33  ;;  %v505_v47 = vmul.f32 -0.5, %v1695_v33 }
  0xaa   : > { %1704 = vlog2.f32 %v493_v21  ;;  %v497_v43 = vadd.f32 1.0, %v496_v23  ;;  %v508_v50 = vand.u32 2147483647, %v1695_v33  ;;  %v511_v53 = vadd.f32 1.0, %v1697_v41  ;;  %v368_v21 = vld [vmem:[%s2221_s5 + $0x20] sm:$0xff] }
  0xab   : > { %v514_v55 = vmul.f32 -0.5, %v1697_v41  ;;  %vm2326_vm0 = vcmp.lt.f32.partialorder %v490_v28, 0.0004427343  ;;  %vm2330_vm1 = vcmp.lt.f32.partialorder %v499_v30, 0.0004427343  ;;  %1706 = vlog2.f32 %v502_v46 }
  0xac   : > { %v506_v9 = vadd.f32 1.0, %v505_v47  ;;  %1708 = vlog2.f32 %v511_v53  ;;  %v466_v13 = vmul.f32 1.442695, %v443_v38  ;;  %v1699_v23 = vpop.eup %1698  ;;  %v489_v36 = vmul.f32 %v1691_v2, %v488_v42 }
  0xad   : > { %v515_v12 = vadd.f32 1.0, %v514_v55  ;;  %v498_v24 = vmul.f32 %v1693_v11, %v497_v43  ;;  %v517_v26 = vand.u32 2147483647, %v1697_v41  ;;  %v2337_v28 = vunpack.c.l.bf16 %v344_v48  ;;  %v1701_v18 = vpop.eup %1700  ;;  %v758_v43 = vld [vmem:[#allocation2 + $0x10] sm:$0xff] }
  0xae   : > { %vm2339_vm2 = vcmp.lt.f32.partialorder %v508_v50, 0.0004427343  ;;  %v520_v0 = vadd.f32 1.0, %v1699_v23  ;;  %v523_v46 = vmul.f32 -0.5, %v1699_v23  ;;  %v529_v47 = vadd.f32 1.0, %v1701_v18 }
  0xaf   : > { %v532_v53 = vmul.f32 -0.5, %v1701_v18  ;;  %1710 = vpow2.f32 %v464_v57  ;;  %v2344_v38 = vunpack.c.l.bf16 %v368_v21  ;;  %v507_v55 = vmul.f32 %v1695_v33, %v506_v9 }
  0xb0   : > { %v2346_v2 = vmul.f32 %v1697_v41, %v515_v12  ;;  %v524_v11 = vadd.f32 1.0, %v523_v46  ;;  %1712 = vpow2.f32 %v466_v13  ;;  %vm2348_vm3 = vcmp.lt.f32.partialorder %v517_v26, 0.0004427343  ;;  %v390_v13 = vld [vmem:[#allocation8 + $0x10] sm:$0xff] }
  0xb1   : > { %3165 = vst [vmem:[#allocation22_spill] sm:$0xff] %v2344_v38  ;;  %1714 = vlog2.f32 %v520_v0  ;;  %v526_v50 = vand.u32 2147483647, %v1699_v23  ;;  %v533_v1 = vadd.f32 1.0, %v532_v53  ;;  %v428_v31 = vand.u32 2147483647, %v2337_v28 }
  0xb2   : > { %1716 = vlog2.f32 %v529_v47  ;;  %v535_v57 = vand.u32 2147483647, %v1701_v18  ;;  %v636_v33 = vsub.f32 0.0, %v2337_v28  ;;  %v2354_v9 = vmul.f32 %v1699_v23, %v524_v11 }
  0xb3   : > { %v1703_v42 = vpop.eup %1702  ;;  %v2360_v26 = vmul.f32 %v1701_v18, %v533_v1  ;;  %v444_v46 = vsub.f32 0.0, %v428_v31  ;;  %v2362_v53 = vunpack.c.h.bf16 %v344_v48  ;;  %vm2373_vm4 = vcmp.lt.f32.partialorder %v526_v50, 0.0004427343  ;;  %v388_v18 = vld [vmem:[#allocation8] sm:$0xff]  ;;  %v389_v31 = vld [vmem:[#allocation8 + $0x8] sm:$0xff] }
  0xb4   : > { %v1705_v59 = vpop.eup %1704  ;;  %v486_v56 = vmul.f32 0.6931472, %v1703_v42  ;;  %vm2394_vm5 = vcmp.lt.f32.partialorder %v535_v57, 0.0004427343 }
  0xb5   : > { %v495_v41 = vmul.f32 0.6931472, %v1705_v59  ;;  %v1707_v42 = vpop.eup %1706 }
  0xb6   : > { %v492_v0 = vsel %vm2326_vm0, %v489_v36, %v486_v56  ;;  %v2377_v56 = vmax.f32 %v636_v33, 0.0  ;;  %v1709_v1 = vpop.eup %1708 }
  0xb7   : > { %v2365_v47 = vadd.f32 %v2268_v25, %v492_v0  ;;  %v2369_v59 = vadd.f32 %v676_v14, %v492_v0  ;;  %v501_v23 = vsel %vm2330_vm1, %v498_v24, %v495_v41  ;;  %v504_v14 = vmul.f32 0.6931472, %v1707_v42 }
  0xb8   : > { %v2380_v36 = vadd.f32 %v2273_v29, %v501_v23  ;;  %v2384_v3 = vadd.f32 %v677_v22, %v501_v23  ;;  %v2386_v25 = vunpack.c.h.bf16 %v368_v21  ;;  %v513_v11 = vmul.f32 0.6931472, %v1709_v1 }
  0xb9   : > { %v708_v24 = vmul.f32 %v2365_v47, %v2244_v4  ;;  %v724_v48 = vmul.f32 %v2369_v59, %v3077_v10  ;;  %v981_v62 = vsub.f32 0.0, %v2365_v47  ;;  %v510_v33 = vsel %vm2339_vm2, %v507_v55, %v504_v14  ;;  %v2409_v41 = vpop.eup %1710  ;;  %v756_v10 = vld [vmem:[#allocation2] sm:$0xff] }
  0xba   : > { %3170 = vst [vmem:[#allocation23_spill] sm:$0xff] %v2386_v25  ;;  %v709_v22 = vmul.f32 %v2380_v36, %v2248_v6  ;;  %v725_v21 = vmul.f32 %v2384_v3, %v3078_v17  ;;  %v982_v50 = vsub.f32 0.0, %v2380_v36  ;;  %v2414_v23 = vadd.f32 %v2287_v44, %v510_v33  ;;  %v2416_v1 = vpop.eup %1712 }
  0xbb   : > { %v2411_v57 = vadd.f32 %v724_v48, %v708_v24  ;;  %v772_v0 = vmul.f32 %v708_v24, %v388_v18  ;;  %v997_v42 = vmul.f32 1.442695, %v981_v62  ;;  %v2422_v30 = vadd.f32 %v678_v37, %v510_v33  ;;  %v1715_v14 = vpop.eup %1714  ;;  %v757_v24 = vld [vmem:[#allocation2 + $0x8] sm:$0xff] }
  0xbc   : > { %3173 = vst [vmem:[#allocation24_spill] sm:$0xff] %v2414_v23  ;;  %v2418_v12 = vadd.f32 %v725_v21, %v709_v22  ;;  %v773_v17 = vmul.f32 %v709_v22, %v389_v31  ;;  %v2425_v55 = vunpack.c.l.bf16 %v2399_v5  ;;  %v999_v44 = vmul.f32 1.442695, %v982_v50  ;;  %v1717_v21 = vpop.eup %1716 }
  0xbd   : > { %3174 = vst [vmem:[#allocation25_spill] sm:$0xff] %v2422_v30  ;;  %v788_v18 = vadd.f32 %v772_v0, %v2411_v57  ;;  %v710_v48 = vmul.f32 %v2414_v23, %v2261_v19  ;;  %v2430_v62 = vmul.f32 1.442695, %v444_v46  ;;  %1718 = vpow2.f32 %v997_v42  ;;  %v391_v42 = vld [vmem:[#allocation8 + $0x18] sm:$0xff] }
  0xbe   : > { %v789_v31 = vadd.f32 %v773_v17, %v2418_v12  ;;  %v726_v16 = vmul.f32 %v2422_v30, %v3079_v32  ;;  %v519_v37 = vsel %vm2348_vm3, %v2346_v2, %v513_v11  ;;  %v983_v50 = vsub.f32 0.0, %v2414_v23 }
  0xbf   : > { %v804_v22 = vadd.f32 %v788_v18, %v756_v10  ;;  %v774_v33 = vmul.f32 %v710_v48, %v390_v13  ;;  %v2441_v0 = vadd.f32 %v2296_v51, %v519_v37  ;;  %v2447_v17 = vadd.f32 %v679_v52, %v519_v37  ;;  %v392_v37 = vld [vmem:[#allocation8 + $0x20] sm:$0xff] }
  0xc0   : > { %v805_v46 = vadd.f32 %v789_v31, %v757_v24  ;;  %v2443_v40 = vadd.f32 %v726_v16, %v710_v48  ;;  %v522_v32 = vmul.f32 0.6931472, %v1715_v14  ;;  %1720 = vpow2.f32 %v999_v44 }
  0xc1   : > { %3175 = vst [vmem:[#allocation26_spill] sm:$0xff] %v2441_v0  ;;  %3176 = vst [vmem:[#allocation27_spill] sm:$0xff] %v2447_v17  ;;  %v711_v10 = vmul.f32 %v2441_v0, %v2270_v27  ;;  %v984_v2 = vsub.f32 0.0, %v2441_v0  ;;  %v531_v13 = vmul.f32 0.6931472, %v1717_v21  ;;  %v3177_v11 = vsub.f32 1.0, %v2270_v27 }
  0xc2   : > { %820 = vst [vmem:[#allocation2] sm:$0xff] %v804_v22  ;;  %821 = vst [vmem:[#allocation2 + $0x8] sm:$0xff] %v805_v46  ;;  %v790_v51 = vadd.f32 %v774_v33, %v2443_v40  ;;  %v528_v20 = vsel %vm2373_vm4, %v2354_v9, %v522_v32  ;;  %v538_v52 = vadd.f32 1.0, %v2409_v41  ;;  %v1001_v14 = vmul.f32 1.442695, %v983_v50  ;;  %v759_v32 = vld [vmem:[#allocation2 + $0x18] sm:$0xff] }
  0xc3   : > { %v727_v18 = vmul.f32 %v2447_v17, %v3177_v11  ;;  %v775_v24 = vmul.f32 %v711_v10, %v391_v42  ;;  %v2461_v44 = vadd.f32 %v2309_v63, %v528_v20  ;;  %v3179_v48 = vmax.f32 %v2277_v34, 0.0 }
  0xc4   : > { %v806_v31 = vadd.f32 %v790_v51, %v758_v43  ;;  %v537_v60 = vsel %vm2394_vm5, %v2360_v26, %v531_v13  ;;  %1722 = vlog2.f32 %v538_v52  ;;  %v1003_v9 = vmul.f32 1.442695, %v984_v2  ;;  %v393_v13 = vld [vmem:[#allocation8 + $0x28] sm:$0xff] }
  0xc5   : > { %3178 = vst [vmem:[#allocation28_spill] sm:$0xff] %v2461_v44  ;;  %v2465_v21 = vadd.f32 %v3179_v48, %v528_v20  ;;  %v2467_v16 = vadd.f32 %v727_v18, %v711_v10  ;;  %v712_v22 = vmul.f32 %v2461_v44, %v2289_v45  ;;  %v3181_v63 = vsub.f32 1.0, %v2289_v45  ;;  %v760_v18 = vld [vmem:[#allocation2 + $0x20] sm:$0xff] }
  0xc6   : > { %v985_v33 = vsub.f32 0.0, %v2461_v44  ;;  %822 = vst [vmem:[#allocation2 + $0x10] sm:$0xff] %v806_v31  ;;  %v2480_v46 = vadd.f32 %v2317_v15, %v537_v60  ;;  %v3183_v26 = vmax.f32 %v2282_v39, 0.0  ;;  %v541_v42 = vmul.f32 -0.5, %v2409_v41 }
  0xc7   : > { %3180 = vst [vmem:[#allocation29_spill] sm:$0xff] %v2465_v21  ;;  %v728_v34 = vmul.f32 %v2465_v21, %v3181_v63  ;;  %v791_v50 = vadd.f32 %v775_v24, %v2467_v16  ;;  %1724 = vpow2.f32 %v1001_v14  ;;  %v776_v10 = vmul.f32 %v712_v22, %v392_v37  ;;  %v2489_v51 = vpop.eup %1718 }
  0xc8   : > { %3182 = vst [vmem:[#allocation30_spill] sm:$0xff] %v2480_v46  ;;  %v2484_v29 = vadd.f32 %v3183_v26, %v537_v60  ;;  %v1005_v2 = vmul.f32 1.442695, %v985_v33  ;;  %v713_v15 = vmul.f32 %v2480_v46, %v2293_v49  ;;  %v3185_v20 = vsub.f32 1.0, %v2293_v49 }
  0xc9   : > { %v2487_v43 = vadd.f32 %v728_v34, %v712_v22  ;;  %v807_v11 = vadd.f32 %v791_v50, %v759_v32  ;;  %v986_v52 = vsub.f32 0.0, %v2480_v46  ;;  %1726 = vpow2.f32 %v1003_v9  ;;  %v761_v34 = vld [vmem:[#allocation2 + $0x28] sm:$0xff] }
  0xca   : > { %3184 = vst [vmem:[#allocation31_spill] sm:$0xff] %v2484_v29  ;;  %v729_v39 = vmul.f32 %v2484_v29, %v3185_v20  ;;  %v542_v24 = vadd.f32 1.0, %v541_v42  ;;  %v544_v48 = vand.u32 2147483647, %v2409_v41  ;;  %v777_v37 = vmul.f32 %v713_v15, %v393_v13  ;;  %v2502_v22 = vpop.eup %1720 }
  0xcb   : > { %v792_v14 = vadd.f32 %v776_v10, %v2487_v43  ;;  %823 = vst [vmem:[#allocation2 + $0x18] sm:$0xff] %v807_v11  ;;  %v1007_v60 = vmul.f32 1.442695, %v986_v52  ;;  %v547_v32 = vadd.f32 1.0, %v2416_v1  ;;  %1728 = vpow2.f32 %v1005_v2  ;;  %v369_v10 = vld [vmem:[%s2221_s5 + $0x28] sm:$0xff] }
  0xcc   : > { %v2499_v31 = vadd.f32 %v729_v39, %v713_v15  ;;  %v550_v9 = vmul.f32 -0.5, %v2416_v1  ;;  %v553_v33 = vand.u32 2147483647, %v2416_v1  ;;  %v429_v26 = vand.u32 2147483647, %v2362_v53 }
  0xcd   : > { %v808_v63 = vadd.f32 %v792_v14, %v760_v18  ;;  %1730 = vpow2.f32 %v1007_v60  ;;  %v637_v42 = vsub.f32 0.0, %v2362_v53  ;;  %v543_v13 = vmul.f32 %v2409_v41, %v542_v24 }
  0xce   : > { %v793_v50 = vadd.f32 %v777_v37, %v2499_v31  ;;  %1732 = vlog2.f32 %v547_v32  ;;  %v551_v11 = vadd.f32 1.0, %v550_v9  ;;  %v1723_v18 = vpop.eup %1722  ;;  %vm545_vm6 = vcmp.lt.f32.partialorder %v544_v48, 0.0004427343 }
  0xcf   : > { %824 = vst [vmem:[#allocation2 + $0x20] sm:$0xff] %v808_v63  ;;  %1734 = vpow2.f32 %v2430_v62  ;;  %v445_v20 = vsub.f32 0.0, %v429_v26  ;;  %v540_v39 = vmul.f32 0.6931472, %v1723_v18  ;;  %vm2513_vm7 = vcmp.lt.f32.partialorder %v553_v33, 0.0004427343 }
  0xd0   : > { %v809_v15 = vadd.f32 %v793_v50, %v761_v34  ;;  %v2517_v14 = vunpack.c.l.bf16 %v369_v10  ;;  %v430_v37 = vand.u32 2147483647, %v2425_v55  ;;  %v2520_v24 = vmax.f32 %v637_v42, 0.0  ;;  %v394_v33 = vld [vmem:[#allocation8 + $0x30] sm:$0xff] }
  0xd1   : > { %v470_v41 = vmul.f32 1.442695, %v445_v20  ;;  %v2524_v48 = vunpack.c.h.bf16 %v2399_v5  ;;  %v2526_v62 = vpop.eup %1724  ;;  %v546_v32 = vsel %vm545_vm6, %v543_v13, %v540_v39  ;;  %v552_v63 = vmul.f32 %v2416_v1, %v551_v11  ;;  %v346_v18 = vld [vmem:[%s2214_s4 + $0x30] sm:$0xff] }
  0xd2   : > { %3188 = vst [vmem:[#allocation32_spill] sm:$0xff] %v2517_v14  ;;  %825 = vst [vmem:[#allocation2 + $0x28] sm:$0xff] %v809_v15  ;;  %v446_v34 = vsub.f32 0.0, %v430_v37  ;;  %v638_v9 = vsub.f32 0.0, %v2425_v55  ;;  %v2531_v50 = vadd.f32 %v2322_v35, %v546_v32  ;;  %v3191_v26 = vmax.f32 %v2299_v54, 0.0 }
  0xd3   : > { %3189 = vst [vmem:[#allocation33_spill] sm:$0xff] %v2526_v62  ;;  %1736 = vpow2.f32 %v470_v41  ;;  %v2537_v5 = vunpack.c.h.bf16 %v369_v10  ;;  %v2540_v15 = vpop.eup %1726  ;;  %v431_v20 = vand.u32 2147483647, %v2524_v48  ;;  %v3195_v54 = vsub.f32 1.0, %v2306_v61  ;;  %v370_v41 = vld [vmem:[%s2221_s5 + $0x30] sm:$0xff] }
  0xd4   : > { %3190 = vst [vmem:[#allocation34_spill] sm:$0xff] %v2531_v50  ;;  %v2535_v42 = vadd.f32 %v3191_v26, %v546_v32  ;;  %3194 = vst [vmem:[#allocation37_spill] sm:$0xff] %v2540_v15  ;;  %v472_v13 = vmul.f32 1.442695, %v446_v34  ;;  %v714_v35 = vmul.f32 %v2531_v50, %v2306_v61  ;;  %v987_v10 = vsub.f32 0.0, %v2531_v50  ;;  %v762_v50 = vld [vmem:[#allocation2 + $0x30] sm:$0xff] }
  0xd5   : > { %3193 = vst [vmem:[#allocation36_spill] sm:$0xff] %v2537_v5  ;;  %v639_v37 = vsub.f32 0.0, %v2524_v48  ;;  %v2553_v32 = vpop.eup %1728  ;;  %v2555_v34 = vmax.f32 %v638_v9, 0.0  ;;  %v447_v26 = vsub.f32 0.0, %v431_v20  ;;  %v2557_v1 = vunpack.c.l.bf16 %v346_v18 }
  0xd6   : > { %3192 = vst [vmem:[#allocation35_spill] sm:$0xff] %v2535_v42  ;;  %v730_v39 = vmul.f32 %v2535_v42, %v3195_v54  ;;  %3196 = vst [vmem:[#allocation38_spill] sm:$0xff] %v2553_v32  ;;  %1738 = vpow2.f32 %v472_v13  ;;  %v778_v60 = vmul.f32 %v714_v35, %v394_v33  ;;  %v1009_v61 = vmul.f32 1.442695, %v987_v10 }
  0xd7   : > { %v2559_v11 = vpop.eup %1730  ;;  %v474_v49 = vmul.f32 1.442695, %v447_v26  ;;  %v2565_v46 = vunpack.c.l.bf16 %v370_v41  ;;  %v432_v9 = vand.u32 2147483647, %v2557_v1  ;;  %v640_v33 = vsub.f32 0.0, %v2557_v1 }
  0xd8   : > { %3197 = vst [vmem:[#allocation39_spill] sm:$0xff] %v2559_v11  ;;  %v2561_v2 = vadd.f32 %v730_v39, %v714_v35  ;;  %v1733_v42 = vpop.eup %1732  ;;  %v2569_v11 = vmax.f32 %v639_v37, 0.0  ;;  %v763_v37 = vld [vmem:[#allocation2 + $0x38] sm:$0xff] }
  0xd9   : > { %3198 = vst [vmem:[#allocation40_spill] sm:$0xff] %v2565_v46  ;;  %v1735_v13 = vpop.eup %1734  ;;  %v549_v45 = vmul.f32 0.6931472, %v1733_v42  ;;  %1740 = vpow2.f32 %v474_v49  ;;  %v448_v29 = vsub.f32 0.0, %v432_v9  ;;  %v395_v49 = vld [vmem:[#allocation8 + $0x38] sm:$0xff] }
  0xda   : > { %v794_v20 = vadd.f32 %v778_v60, %v2561_v2  ;;  %v556_v35 = vadd.f32 1.0, %v1735_v13  ;;  %v559_v39 = vmul.f32 -0.5, %v1735_v13  ;;  %1742 = vpow2.f32 %v1009_v61 }
  0xdb   : > { %v555_v54 = vsel %vm2513_vm7, %v552_v63, %v549_v45  ;;  %v3200_v60 = vmax.f32 %v2303_v58, 0.0  ;;  %v476_v61 = vmul.f32 1.442695, %v448_v29  ;;  %v2591_v63 = vunpack.c.h.bf16 %v370_v41 }
  0xdc   : > { %v810_v26 = vadd.f32 %v794_v20, %v762_v50  ;;  %v2576_v32 = vadd.f32 %v2334_v7, %v555_v54  ;;  %1744 = vlog2.f32 %v556_v35  ;;  %v560_v10 = vadd.f32 1.0, %v559_v39 }
  0xdd   : > { %v2580_v42 = vadd.f32 %v3200_v60, %v555_v54  ;;  %v1737_v21 = vpop.eup %1736  ;;  %v562_v50 = vand.u32 2147483647, %v1735_v13  ;;  %v2583_v20 = vunpack.c.h.bf16 %v346_v18  ;;  %v3202_v7 = vsub.f32 1.0, %v2314_v8  ;;  %3203 = vst [vmem:[#allocation43_spill] sm:$0xff] %v2591_v63 }
  0xde   : > { %3199 = vst [vmem:[#allocation41_spill] sm:$0xff] %v2576_v32  ;;  %826 = vst [vmem:[#allocation2 + $0x30] sm:$0xff] %v810_v26  ;;  %v715_v45 = vmul.f32 %v2576_v32, %v2314_v8  ;;  %v988_v52 = vsub.f32 0.0, %v2576_v32  ;;  %v565_v54 = vadd.f32 1.0, %v1737_v21  ;;  %v568_v9 = vmul.f32 -0.5, %v1737_v21 }
  0xdf   : > { %3201 = vst [vmem:[#allocation42_spill] sm:$0xff] %v2580_v42  ;;  %v731_v58 = vmul.f32 %v2580_v42, %v3202_v7  ;;  %v571_v35 = vand.u32 2147483647, %v1737_v21  ;;  %1746 = vpow2.f32 %v476_v61  ;;  %v2595_v60 = vmax.f32 %v640_v33, 0.0 }
  0xe0   : > { %v1739_v39 = vpop.eup %1738  ;;  %v779_v18 = vmul.f32 %v715_v45, %v395_v49  ;;  %v1011_v26 = vmul.f32 1.442695, %v988_v52  ;;  %v561_v8 = vmul.f32 %v1735_v13, %v560_v10  ;;  %vm2597_vm8 = vcmp.lt.f32.partialorder %v562_v50, 0.0004427343  ;;  %v2610_v10 = vld [vmem:[%s2221_s5 + $0x38] sm:$0xff] }
  0xe1   : > { %v2593_v29 = vadd.f32 %v731_v58, %v715_v45  ;;  %1748 = vlog2.f32 %v565_v54  ;;  %v574_v41 = vadd.f32 1.0, %v1739_v39  ;;  %v569_v32 = vadd.f32 1.0, %v568_v9  ;;  %v347_v58 = vld [vmem:[%s2214_s4 + $0x38] sm:$0xff] }
  0xe2   : > { %v577_v61 = vmul.f32 -0.5, %v1739_v39  ;;  %v580_v44 = vand.u32 2147483647, %v1739_v39  ;;  %vm2603_vm9 = vcmp.lt.f32.partialorder %v571_v35, 0.0004427343  ;;  %v641_v54 = vsub.f32 0.0, %v2583_v20 }
  0xe3   : > { %v795_v42 = vadd.f32 %v779_v18, %v2593_v29  ;;  %1750 = vlog2.f32 %v574_v41  ;;  %v433_v13 = vand.u32 2147483647, %v2583_v20  ;;  %v1741_v50 = vpop.eup %1740  ;;  %v570_v41 = vmul.f32 %v1737_v21, %v569_v32 }
  0xe4   : > { %1752 = vpow2.f32 %v1011_v26  ;;  %v578_v52 = vadd.f32 1.0, %v577_v61  ;;  %v2613_v9 = vpop.eup %1742  ;;  %v583_v18 = vadd.f32 1.0, %v1741_v50  ;;  %v586_v35 = vmul.f32 -0.5, %v1741_v50 }
  0xe5   : > { %v811_v45 = vadd.f32 %v795_v42, %v763_v37  ;;  %3208 = vst [vmem:[#allocation44_spill] sm:$0xff] %v2613_v9  ;;  %v589_v27 = vand.u32 2147483647, %v1741_v50  ;;  %v449_v19 = vsub.f32 0.0, %v433_v13  ;;  %vm2615_vm10 = vcmp.lt.f32.partialorder %v580_v44, 0.0004427343 }
  0xe6   : > { %v1745_v15 = vpop.eup %1744  ;;  %v2619_v17 = vunpack.c.l.bf16 %v347_v58  ;;  %v2622_v42 = vunpack.c.l.bf16 %v2610_v10  ;;  %1754 = vlog2.f32 %v583_v18  ;;  %v587_v26 = vadd.f32 1.0, %v586_v35 }
  0xe7   : > { %827 = vst [vmem:[#allocation2 + $0x38] sm:$0xff] %v811_v45  ;;  %v558_v37 = vmul.f32 0.6931472, %v1745_v15  ;;  %v579_v9 = vmul.f32 %v1739_v39, %v578_v52  ;;  %v478_v0 = vmul.f32 1.442695, %v449_v19  ;;  %v2625_v13 = vmax.f32 %v641_v54, 0.0 }
  0xe8   : > { %3211 = vst [vmem:[#allocation45_spill] sm:$0xff] %v2622_v42  ;;  %v434_v21 = vand.u32 2147483647, %v2619_v17  ;;  %v588_v45 = vmul.f32 %v1741_v50, %v587_v26  ;;  %vm2630_vm11 = vcmp.lt.f32.partialorder %v589_v27, 0.0004427343  ;;  %v642_v18 = vsub.f32 0.0, %v2619_v17 }
  0xe9   : > { %v1747_v44 = vpop.eup %1746  ;;  %v564_v32 = vsel %vm2597_vm8, %v561_v8, %v558_v37  ;;  %v3214_v19 = vmax.f32 %v2337_v28, 0.0  ;;  %v396_v8 = vld [vmem:[#allocation8 + $0x40] sm:$0xff]  ;;  %1756 = vpow2.f32 %v478_v0  ;;  %v3216_v15 = vsub.f32 1.0, %v2344_v38 }
  0xea   : > { %v2637_v39 = vadd.f32 %v2377_v56, %v564_v32  ;;  %v592_v54 = vadd.f32 1.0, %v1747_v44  ;;  %v595_v35 = vmul.f32 -0.5, %v1747_v44  ;;  %v598_v50 = vand.u32 2147483647, %v1747_v44 }
  0xeb   : > { %v2641_v52 = vadd.f32 %v3214_v19, %v564_v32  ;;  %v1749_v7 = vpop.eup %1748  ;;  %v450_v27 = vsub.f32 0.0, %v434_v21  ;;  %v2650_v30 = vmax.f32 %v642_v18, 0.0  ;;  %v2652_v23 = vunpack.c.h.bf16 %v347_v58 }
  0xec   : > { %v716_v26 = vmul.f32 %v2637_v39, %v2344_v38  ;;  %v989_v28 = vsub.f32 0.0, %v2637_v39  ;;  %v567_v32 = vmul.f32 0.6931472, %v1749_v7  ;;  %1758 = vlog2.f32 %v592_v54 }
  0xed   : > { %3215 = vst [vmem:[#allocation46_spill] sm:$0xff] %v2641_v52  ;;  %v732_v56 = vmul.f32 %v2641_v52, %v3216_v15  ;;  %v1751_v19 = vpop.eup %1750  ;;  %v596_v61 = vadd.f32 1.0, %v595_v35  ;;  %v764_v15 = vld [vmem:[#allocation2 + $0x40] sm:$0xff]  ;;  %v3217_v54 = vmax.f32 %v2362_v53, 0.0  ;;  %vm2667_vm12 = vcmp.lt.f32.partialorder %v598_v50, 0.0004427343 }
  0xee   : > { %v2654_v0 = vpop.eup %1752  ;;  %v780_v37 = vmul.f32 %v716_v26, %v396_v8  ;;  %v1013_v6 = vmul.f32 1.442695, %v989_v28  ;;  %v573_v38 = vsel %vm2603_vm9, %v570_v41, %v567_v32  ;;  %v576_v18 = vmul.f32 0.6931472, %v1751_v19 }
  0xef   : > { %v2656_v21 = vadd.f32 %v732_v56, %v716_v26  ;;  %v2661_v52 = vadd.f32 %v2520_v24, %v573_v38  ;;  %v2665_v35 = vadd.f32 %v3217_v54, %v573_v38  ;;  %v480_v7 = vmul.f32 1.442695, %v450_v27  ;;  %v397_v26 = vld [vmem:[#allocation8 + $0x48] sm:$0xff]  ;;  %v398_v54 = vld [vmem:[#allocation8 + $0x50] sm:$0xff] }
  0xf0   : > { %1760 = vpow2.f32 %v1013_v6  ;;  %v597_v49 = vmul.f32 %v1747_v44, %v596_v61  ;;  %v2673_v41 = vunpack.c.h.bf16 %v2610_v10  ;;  %v1755_v24 = vpop.eup %1754  ;;  %v3220_v38 = vsub.f32 1.0, %v2386_v25 }
  0xf1   : > { %v796_v8 = vadd.f32 %v780_v37, %v2656_v21  ;;  %v717_v53 = vmul.f32 %v2661_v52, %v2386_v25  ;;  %v990_v56 = vsub.f32 0.0, %v2661_v52  ;;  %v582_v27 = vsel %vm2615_vm10, %v579_v9, %v576_v18 }
  0xf2   : > { %v733_v50 = vmul.f32 %v2665_v35, %v3220_v38  ;;  %v2684_v6 = vadd.f32 %v2555_v34, %v582_v27  ;;  %v3222_v10 = vmax.f32 %v2425_v55, 0.0  ;;  %v585_v44 = vmul.f32 0.6931472, %v1755_v24  ;;  %v765_v38 = vld [vmem:[#allocation2 + $0x48] sm:$0xff] }
  0xf3   : > { %v812_v37 = vadd.f32 %v796_v8, %v764_v15  ;;  %v781_v32 = vmul.f32 %v717_v53, %v397_v26  ;;  %v1015_v19 = vmul.f32 1.442695, %v990_v56  ;;  %1762 = vpow2.f32 %v480_v7  ;;  %v1757_v18 = vpop.eup %1756 }
  0xf4   : > { %3221 = vst [vmem:[#allocation47_spill] sm:$0xff] %v2684_v6  ;;  %v2688_v61 = vadd.f32 %v3222_v10, %v582_v27  ;;  %v2690_v28 = vadd.f32 %v733_v50, %v717_v53  ;;  %v718_v33 = vmul.f32 %v2684_v6, %v2517_v14  ;;  %v3224_v9 = vsub.f32 1.0, %v2517_v14  ;;  %v767_v14 = vld [vmem:[#allocation2 + $0x58] sm:$0xff] }
  0xf5   : > { %828 = vst [vmem:[#allocation2 + $0x40] sm:$0xff] %v812_v37  ;;  %v991_v55 = vsub.f32 0.0, %v2684_v6  ;;  %v591_v15 = vsel %vm2630_vm11, %v588_v45, %v585_v44  ;;  %v3226_v7 = vmax.f32 %v2524_v48, 0.0  ;;  %v435_v53 = vand.u32 2147483647, %v2652_v23  ;;  %v399_v37 = vld [vmem:[#allocation8 + $0x58] sm:$0xff] }
  0xf6   : > { %3223 = vst [vmem:[#allocation48_spill] sm:$0xff] %v2688_v61  ;;  %v734_v34 = vmul.f32 %v2688_v61, %v3224_v9  ;;  %v797_v8 = vadd.f32 %v781_v32, %v2690_v28  ;;  %v2702_v26 = vadd.f32 %v2569_v11, %v591_v15  ;;  %v782_v56 = vmul.f32 %v718_v33, %v398_v54  ;;  %v1759_v62 = vpop.eup %1758  ;;  %v766_v44 = vld [vmem:[#allocation2 + $0x50] sm:$0xff]  ;;  %v901_v6 = vld [vmem:[#allocation2 + $0x80] sm:$0xff] }
  0xf7   : > { %v2706_v24 = vadd.f32 %v3226_v7, %v591_v15  ;;  %v1017_v27 = vmul.f32 1.442695, %v991_v55  ;;  %v601_v10 = vadd.f32 1.0, %v1757_v18  ;;  %v3228_v11 = vsub.f32 1.0, %v2537_v5 }
  0xf8   : > { %3225 = vst [vmem:[#allocation49_spill] sm:$0xff] %v2702_v26  ;;  %v2709_v50 = vadd.f32 %v734_v34, %v718_v33  ;;  %v813_v45 = vadd.f32 %v797_v8, %v765_v38  ;;  %v719_v32 = vmul.f32 %v2702_v26, %v2537_v5  ;;  %v992_v9 = vsub.f32 0.0, %v2702_v26 }
  0xf9   : > { %3227 = vst [vmem:[#allocation50_spill] sm:$0xff] %v2706_v24  ;;  %v735_v48 = vmul.f32 %v2706_v24, %v3228_v11  ;;  %1764 = vpow2.f32 %v1015_v19  ;;  %v594_v15 = vmul.f32 0.6931472, %v1759_v62  ;;  %v604_v54 = vmul.f32 -0.5, %v1757_v18 }
  0xfa   : > { %v798_v34 = vadd.f32 %v782_v56, %v2709_v50  ;;  %829 = vst [vmem:[#allocation2 + $0x48] sm:$0xff] %v813_v45  ;;  %v783_v55 = vmul.f32 %v719_v32, %v399_v37  ;;  %v1019_v38 = vmul.f32 1.442695, %v992_v9  ;;  %1766 = vlog2.f32 %v601_v10  ;;  %v2720_v8 = vpop.eup %1760  ;;  %v400_v10 = vld [vmem:[#allocation8 + $0x60] sm:$0xff] }
  0xfb   : > { %v2718_v33 = vadd.f32 %v735_v48, %v719_v32  ;;  %v600_v11 = vsel %vm2667_vm12, %v597_v49, %v594_v15  ;;  %v605_v5 = vadd.f32 1.0, %v604_v54  ;;  %v607_v24 = vand.u32 2147483647, %v1757_v18  ;;  %v768_v54 = vld [vmem:[#allocation2 + $0x60] sm:$0xff] }
  0xfc   : > { %v814_v7 = vadd.f32 %v798_v34, %v766_v44  ;;  %1768 = vpow2.f32 %v1017_v27  ;;  %v2726_v56 = vadd.f32 %v2595_v60, %v600_v11  ;;  %v3230_v62 = vmax.f32 %v2557_v1, 0.0 }
  0xfd   : > { %v799_v19 = vadd.f32 %v783_v55, %v2718_v33  ;;  %1770 = vpow2.f32 %v1019_v38  ;;  %v606_v45 = vmul.f32 %v1757_v18, %v605_v5  ;;  %vm2732_vm13 = vcmp.lt.f32.partialorder %v607_v24, 0.0004427343  ;;  %v1763_v49 = vpop.eup %1762 }
  0xfe   : > { %3229 = vst [vmem:[#allocation51_spill] sm:$0xff] %v2726_v56  ;;  %v2730_v37 = vadd.f32 %v3230_v62, %v600_v11  ;;  %830 = vst [vmem:[#allocation2 + $0x50] sm:$0xff] %v814_v7  ;;  %v451_v58 = vsub.f32 0.0, %v435_v53  ;;  %v720_v32 = vmul.f32 %v2726_v56, %v2565_v46  ;;  %v3234_v60 = vsub.f32 1.0, %v2565_v46 }
  0xff   : > { %v815_v27 = vadd.f32 %v799_v19, %v767_v14  ;;  %v993_v48 = vsub.f32 0.0, %v2726_v56  ;;  %v610_v9 = vadd.f32 1.0, %v1763_v49  ;;  %v613_v34 = vmul.f32 -0.5, %v1763_v49 }
 0x100   : > { %3231 = vst [vmem:[#allocation52_spill] sm:$0xff] %v2730_v37  ;;  %v736_v1 = vmul.f32 %v2730_v37, %v3234_v60  ;;  %v616_v15 = vand.u32 2147483647, %v1763_v49  ;;  %v482_v5 = vmul.f32 1.442695, %v451_v58  ;;  %v784_v24 = vmul.f32 %v720_v32, %v400_v10 }
 0x101   : > { %831 = vst [vmem:[#allocation2 + $0x58] sm:$0xff] %v815_v27  ;;  %v1021_v53 = vmul.f32 1.442695, %v993_v48  ;;  %v643_v14 = vsub.f32 0.0, %v2652_v23  ;;  %1772 = vlog2.f32 %v610_v9  ;;  %v614_v55 = vadd.f32 1.0, %v613_v34 }
 0x102   : > { %v2742_v18 = vadd.f32 %v736_v1, %v720_v32  ;;  %v836_v62 = vsub.f32 0.0, %v2411_v57  ;;  %vm2753_vm14 = vcmp.lt.f32.partialorder %v616_v15, 0.0004427343  ;;  %v837_v32 = vsub.f32 0.0, %v2418_v12 }
 0x103   : > { %1774 = vpow2.f32 %v1021_v53  ;;  %v2748_v19 = vmax.f32 %v643_v14, 0.0  ;;  %v2751_v58 = vpop.eup %1764  ;;  %v615_v10 = vmul.f32 %v1763_v49, %v614_v55  ;;  %v838_v60 = vsub.f32 0.0, %v2443_v40 }
 0x104   : > { %v800_v11 = vadd.f32 %v784_v24, %v2742_v18  ;;  %1776 = vpow2.f32 %v482_v5  ;;  %v1767_v1 = vpop.eup %1766  ;;  %v852_v9 = vmul.f32 1.442695, %v836_v62  ;;  %v839_v34 = vsub.f32 0.0, %v2467_v16 }
 0x105   : > { %v840_v24 = vsub.f32 0.0, %v2487_v43  ;;  %v603_v53 = vmul.f32 0.6931472, %v1767_v1  ;;  %v854_v14 = vmul.f32 1.442695, %v837_v32  ;;  %v2763_v49 = vmul.f32 %v2489_v51, %v2489_v51 }
 0x106   : > { %v816_v48 = vadd.f32 %v800_v11, %v768_v54  ;;  %v856_v38 = vmul.f32 1.442695, %v838_v60  ;;  %v2765_v15 = vpop.eup %1768  ;;  %1778 = vpow2.f32 %v852_v9  ;;  %v858_v5 = vmul.f32 1.442695, %v839_v34 }
 0x107   : > { %3237 = vst [vmem:[#allocation53_spill] sm:$0xff] %v2765_v15  ;;  %v860_v55 = vmul.f32 1.442695, %v840_v24  ;;  %v841_v54 = vsub.f32 0.0, %v2499_v31  ;;  %v2768_v11 = vpop.eup %1770  ;;  %v609_v62 = vsel %vm2732_vm13, %v606_v45, %v603_v53  ;;  %1780 = vpow2.f32 %v854_v14  ;;  %v401_v24 = vld [vmem:[#allocation8 + $0x68] sm:$0xff] }
 0x108   : > { %832 = vst [vmem:[#allocation2 + $0x60] sm:$0xff] %v816_v48  ;;  %3238 = vst [vmem:[#allocation54_spill] sm:$0xff] %v2768_v11  ;;  %v842_v32 = vsub.f32 0.0, %v2561_v2  ;;  %v843_v60 = vsub.f32 0.0, %v2593_v29  ;;  %v2775_v1 = vadd.f32 %v2625_v13, %v609_v62  ;;  %v3240_v48 = vmax.f32 %v2583_v20, 0.0 }
 0x109   : > { %1782 = vpow2.f32 %v856_v38  ;;  %v862_v34 = vmul.f32 1.442695, %v841_v54  ;;  %v844_v45 = vsub.f32 0.0, %v2656_v21  ;;  %v3242_v53 = vsub.f32 1.0, %v2591_v63 }
 0x10a   : > { %3239 = vst [vmem:[#allocation55_spill] sm:$0xff] %v2775_v1  ;;  %v2779_v9 = vadd.f32 %v3240_v48, %v609_v62  ;;  %1784 = vpow2.f32 %v858_v5  ;;  %v864_v7 = vmul.f32 1.442695, %v842_v32  ;;  %v866_v46 = vmul.f32 1.442695, %v843_v60 }
 0x10b   : > { %v721_v44 = vmul.f32 %v2775_v1, %v2591_v63  ;;  %v994_v14 = vsub.f32 0.0, %v2775_v1  ;;  %1786 = vpow2.f32 %v860_v55  ;;  %v1773_v20 = vpop.eup %1772  ;;  %v2788_v38 = vmul.f32 1.442695, %v844_v45 }
 0x10c   : > { %3241 = vst [vmem:[#allocation56_spill] sm:$0xff] %v2779_v9  ;;  %v737_v13 = vmul.f32 %v2779_v9, %v3242_v53  ;;  %1788 = vpow2.f32 %v862_v34  ;;  %v845_v5 = vsub.f32 0.0, %v2690_v28  ;;  %v846_v54 = vsub.f32 0.0, %v2709_v50  ;;  %v769_v53 = vld [vmem:[#allocation2 + $0x68] sm:$0xff] }
 0x10d   : > { %v2792_v62 = vpop.eup %1774  ;;  %v785_v60 = vmul.f32 %v721_v44, %v401_v24  ;;  %v1023_v48 = vmul.f32 1.442695, %v994_v14  ;;  %v612_v63 = vmul.f32 0.6931472, %v1773_v20  ;;  %1790 = vpow2.f32 %v864_v7 }
 0x10e   : > { %3243 = vst [vmem:[#allocation57_spill] sm:$0xff] %v2792_v62  ;;  %v2794_v32 = vadd.f32 %v737_v13, %v721_v44  ;;  %v1777_v37 = vpop.eup %1776  ;;  %v2796_v9 = vmul.f32 1.442695, %v845_v5  ;;  %v2798_v55 = vmul.f32 1.442695, %v846_v54  ;;  %v847_v34 = vsub.f32 0.0, %v2718_v33 }
 0x10f   : > { %1792 = vpow2.f32 %v1023_v48  ;;  %v618_v1 = vsel %vm2753_vm14, %v615_v10, %v612_v63  ;;  %v619_v13 = vadd.f32 1.0, %v1777_v37  ;;  %v3245_v44 = vmax.f32 %v2619_v17, 0.0  ;;  %v402_v62 = vld [vmem:[#allocation8 + $0x70] sm:$0xff] }
 0x110   : > { %v801_v45 = vadd.f32 %v785_v60, %v2794_v32  ;;  %v2805_v24 = vadd.f32 %v2650_v30, %v618_v1  ;;  %v622_v7 = vmul.f32 -0.5, %v1777_v37  ;;  %v625_v20 = vand.u32 2147483647, %v1777_v37  ;;  %v1779_v5 = vpop.eup %1778 }
 0x111   : > { %v2809_v14 = vadd.f32 %v3245_v44, %v618_v1  ;;  %1794 = vlog2.f32 %v619_v13  ;;  %v2811_v56 = vmul.f32 1.442695, %v847_v34  ;;  %v848_v60 = vsub.f32 0.0, %v2742_v18  ;;  %v1781_v27 = vpop.eup %1780 }
 0x112   : > { %3244 = vst [vmem:[#allocation58_spill] sm:$0xff] %v2805_v24  ;;  %v817_v54 = vadd.f32 %v801_v45, %v769_v53  ;;  %v722_v63 = vmul.f32 %v2805_v24, %v2622_v42  ;;  %v3247_v30 = vsub.f32 1.0, %v2622_v42  ;;  %v995_v10 = vsub.f32 0.0, %v2805_v24 }
 0x113   : > { %3246 = vst [vmem:[#allocation59_spill] sm:$0xff] %v2809_v14  ;;  %v623_v1 = vadd.f32 1.0, %v622_v7  ;;  %v1783_v48 = vpop.eup %1782  ;;  %vm2820_vm15 = vcmp.lt.f32.partialorder %v625_v20, 0.0004427343  ;;  %v884_v34 = vsub.f32 1.0, %v1779_v5  ;;  %v885_v45 = vsub.f32 1.0, %v1781_v27 }
 0x114   : > { %v738_v17 = vmul.f32 %v2809_v14, %v3247_v30  ;;  %833 = vst [vmem:[#allocation2 + $0x68] sm:$0xff] %v817_v54  ;;  %1796 = vpow2.f32 %v866_v46  ;;  %v1785_v13 = vpop.eup %1784  ;;  %v786_v11 = vmul.f32 %v722_v63, %v402_v62  ;;  %v1025_v26 = vmul.f32 1.442695, %v995_v10  ;;  %v770_v30 = vld [vmem:[#allocation2 + $0x70] sm:$0xff]  ;;  %v902_v5 = vld [vmem:[#allocation2 + $0x88] sm:$0xff] }
 0x115   : > { %v624_v42 = vmul.f32 %v1777_v37, %v623_v1  ;;  %v1787_v15 = vpop.eup %1786  ;;  %v917_v14 = vmul.f32 %v884_v34, %v884_v34  ;;  %v918_v24 = vmul.f32 %v885_v45, %v885_v45  ;;  %v886_v7 = vsub.f32 1.0, %v1783_v48  ;;  %v903_v34 = vld [vmem:[#allocation2 + $0x90] sm:$0xff]  ;;  %v904_v45 = vld [vmem:[#allocation2 + $0x98] sm:$0xff] }
 0x116   : > { %v2824_v44 = vadd.f32 %v738_v17, %v722_v63  ;;  %v887_v61 = vsub.f32 1.0, %v1785_v13  ;;  %v1789_v54 = vpop.eup %1788  ;;  %1798 = vpow2.f32 %v1025_v26  ;;  %v888_v27 = vsub.f32 1.0, %v1787_v15 }
 0x117   : > { %v876_v46 = vmul.f32 1.442695, %v848_v60  ;;  %v933_v17 = vmul.f32 %v917_v14, %v2411_v57  ;;  %v934_v62 = vmul.f32 %v918_v24, %v2418_v12  ;;  %v919_v63 = vmul.f32 %v886_v7, %v886_v7  ;;  %v1791_v10 = vpop.eup %1790  ;;  %v905_v14 = vld [vmem:[#allocation2 + $0xa0] sm:$0xff]  ;;  %v906_v7 = vld [vmem:[#allocation2 + $0xa8] sm:$0xff] }
 0x118   : > { %v802_v20 = vadd.f32 %v786_v11, %v2824_v44  ;;  %v920_v37 = vmul.f32 %v887_v61, %v887_v61  ;;  %v921_v48 = vmul.f32 %v888_v27, %v888_v27  ;;  %v889_v13 = vsub.f32 1.0, %v1789_v54 }
 0x119   : > { %1800 = vpow2.f32 %v2788_v38  ;;  %v2830_v11 = vpop.eup %1792  ;;  %v949_v26 = vadd.f32 %v933_v17, %v901_v6  ;;  %v950_v25 = vadd.f32 %v934_v62, %v902_v5  ;;  %v935_v15 = vmul.f32 %v919_v63, %v2443_v40  ;;  %v907_v5 = vld [vmem:[#allocation2 + $0xb0] sm:$0xff] }
 0x11a   : > { %v818_v1 = vadd.f32 %v802_v20, %v770_v30  ;;  %v936_v57 = vmul.f32 %v920_v37, %v2467_v16  ;;  %v937_v12 = vmul.f32 %v921_v48, %v2487_v43  ;;  %v922_v61 = vmul.f32 %v889_v13, %v889_v13  ;;  %v908_v48 = vld [vmem:[#allocation2 + $0xb8] sm:$0xff] }
 0x11b   : > { %v890_v24 = vsub.f32 1.0, %v1791_v10  ;;  %1802 = vpow2.f32 %v2796_v9  ;;  %v1795_v60 = vpop.eup %1794  ;;  %965 = vst [vmem:[#allocation2 + $0x80] sm:$0xff] %v949_v26  ;;  %966 = vst [vmem:[#allocation2 + $0x88] sm:$0xff] %v950_v25  ;;  %v951_v38 = vadd.f32 %v935_v15, %v903_v34  ;;  %v849_v40 = vsub.f32 0.0, %v2794_v32 }
 0x11c   : > { %834 = vst [vmem:[#allocation2 + $0x70] sm:$0xff] %v818_v1  ;;  %v952_v30 = vadd.f32 %v936_v57, %v904_v45  ;;  %1804 = vpow2.f32 %v2798_v55  ;;  %v621_v6 = vmul.f32 0.6931472, %v1795_v60  ;;  %v953_v16 = vadd.f32 %v937_v12, %v905_v14 }
 0x11d   : > { %v938_v54 = vmul.f32 %v922_v61, %v2499_v31  ;;  %v923_v20 = vmul.f32 %v890_v24, %v890_v24  ;;  %967 = vst [vmem:[#allocation2 + $0x90] sm:$0xff] %v951_v38  ;;  %1806 = vpow2.f32 %v2811_v56  ;;  %v878_v9 = vmul.f32 1.442695, %v849_v40  ;;  %v771_v38 = vld [vmem:[#allocation2 + $0x78] sm:$0xff] }
 0x11e   : > { %v1797_v43 = vpop.eup %1796  ;;  %968 = vst [vmem:[#allocation2 + $0x98] sm:$0xff] %v952_v30  ;;  %v850_v25 = vsub.f32 0.0, %v2824_v44  ;;  %v1029_v27 = vmin.f32 %v2365_v47, 18.420681  ;;  %v627_v55 = vsel %vm2820_vm15, %v624_v42, %v621_v6  ;;  %969 = vst [vmem:[#allocation2 + $0xa0] sm:$0xff] %v953_v16  ;;  %v3250_v37 = vmax.f32 %v2652_v23, 0.0 }
 0x11f   : > { %v954_v17 = vadd.f32 %v938_v54, %v906_v7  ;;  %v939_v62 = vmul.f32 %v923_v20, %v2561_v2  ;;  %v891_v31 = vsub.f32 1.0, %v1797_v43  ;;  %v2846_v63 = vadd.f32 %v2748_v19, %v627_v55  ;;  %v403_v47 = vld [vmem:[#allocation8 + $0x78] sm:$0xff] }
 0x120   : > { %v2850_v10 = vadd.f32 %v3250_v37, %v627_v55  ;;  %1808 = vpow2.f32 %v876_v46  ;;  %v880_v56 = vmul.f32 1.442695, %v850_v25  ;;  %v2852_v1 = vpop.eup %1798  ;;  %v1045_v34 = vsub.f32 0.0, %v1029_v27 }
 0x121   : > { %970 = vst [vmem:[#allocation2 + $0xa8] sm:$0xff] %v954_v17  ;;  %v955_v53 = vadd.f32 %v939_v62, %v907_v5  ;;  %v924_v42 = vmul.f32 %v891_v31, %v891_v31  ;;  %1810 = vpow2.f32 %v878_v9  ;;  %v723_v2 = vmul.f32 %v2846_v63, %v2673_v41  ;;  %v910_v31 = vld [vmem:[#allocation2 + $0xc8] sm:$0xff] }
 0x122   : > { %v3251_v19 = vsub.f32 1.0, %v2673_v41  ;;  %v996_v23 = vsub.f32 0.0, %v2846_v63  ;;  %1812 = vpow2.f32 %v880_v56  ;;  %v1061_v26 = vmin.f32 %v2369_v59, 18.420681 }
 0x123   : > { %v1801_v46 = vpop.eup %1800  ;;  %971 = vst [vmem:[#allocation2 + $0xb0] sm:$0xff] %v955_v53  ;;  %v940_v13 = vmul.f32 %v924_v42, %v2593_v29  ;;  %v1126_v15 = vmul.f32 %v1045_v34, %v2244_v4  ;;  %v1142_v57 = vsub.f32 1.0, %v2489_v51  ;;  %v787_v12 = vmul.f32 %v723_v2, %v403_v47  ;;  %v909_v51 = vld [vmem:[#allocation2 + $0xc0] sm:$0xff] }
 0x124   : > { %v739_v45 = vmul.f32 %v2850_v10, %v3251_v19  ;;  %v1027_v61 = vmul.f32 1.442695, %v996_v23  ;;  %v892_v24 = vsub.f32 1.0, %v1801_v46  ;;  %v1077_v7 = vsub.f32 0.0, %v1061_v26 }
 0x125   : > { %v1803_v60 = vpop.eup %1802  ;;  %v956_v30 = vadd.f32 %v940_v13, %v908_v48  ;;  %v1158_v40 = vmul.f32 %v1142_v57, %v1126_v15  ;;  %v1190_v6 = vmul.f32 %v2763_v49, %v2763_v49  ;;  %v3252_v5 = vsub.f32 1.0, %v2244_v4  ;;  %v912_v13 = vld [vmem:[#allocation2 + $0xd8] sm:$0xff] }
 0x126   : > { %v2864_v14 = vadd.f32 %v739_v45, %v723_v2  ;;  %v1805_v29 = vpop.eup %1804  ;;  %1814 = vpow2.f32 %v1027_v61  ;;  %v925_v16 = vmul.f32 %v892_v24, %v892_v24  ;;  %v893_v54 = vsub.f32 1.0, %v1803_v60  ;;  %v911_v2 = vld [vmem:[#allocation2 + $0xd0] sm:$0xff]  ;;  %v1110_v60 = vld [vmem:[#allocation2 + $0x100] sm:$0xff] }
 0x127   : > { %972 = vst [vmem:[#allocation2 + $0xb8] sm:$0xff] %v956_v30  ;;  %v894_v20 = vsub.f32 1.0, %v1805_v29  ;;  %v1174_v9 = vmul.f32 %v1077_v7, %v3252_v5  ;;  %v1030_v25 = vmin.f32 %v2380_v36, 18.420681  ;;  %v1807_v27 = vpop.eup %1806  ;;  %v1062_v62 = vmin.f32 %v2384_v3, 18.420681 }
 0x128   : > { %v803_v59 = vadd.f32 %v787_v12, %v2864_v14  ;;  %v851_v43 = vsub.f32 0.0, %v2864_v14  ;;  %v941_v49 = vmul.f32 %v925_v16, %v2656_v21  ;;  %v926_v17 = vmul.f32 %v893_v54, %v893_v54  ;;  %v3253_v7 = vld [vmem:[#allocation15_spill] sm:$0xff]  ;;  %v914_v16 = vld [vmem:[#allocation2 + $0xe8] sm:$0xff] }
 0x129   : > { %v927_v37 = vmul.f32 %v894_v20, %v894_v20  ;;  %v895_v56 = vsub.f32 1.0, %v1807_v27  ;;  %v1206_v53 = vmul.f32 %v1190_v6, %v1174_v9  ;;  %v1046_v19 = vsub.f32 0.0, %v1030_v25  ;;  %v915_v5 = vld [vmem:[#allocation2 + $0xf0] sm:$0xff] }
 0x12a   : > { %v819_v55 = vadd.f32 %v803_v59, %v771_v38  ;;  %v882_v47 = vmul.f32 1.442695, %v851_v43  ;;  %v1809_v42 = vpop.eup %1808  ;;  %v957_v34 = vadd.f32 %v941_v49, %v909_v51  ;;  %v942_v4 = vmul.f32 %v926_v17, %v2690_v28  ;;  %v3255_v49 = vld [vmem:[#allocation24_spill] sm:$0xff] }
 0x12b   : > { %v1078_v36 = vsub.f32 0.0, %v1062_v62  ;;  %v1811_v45 = vpop.eup %1810  ;;  %v943_v23 = vmul.f32 %v927_v37, %v2709_v50  ;;  %v928_v21 = vmul.f32 %v895_v56, %v895_v56  ;;  %v896_v48 = vsub.f32 1.0, %v1809_v42  ;;  %v913_v50 = vld [vmem:[#allocation2 + $0xe0] sm:$0xff] }
 0x12c   : > { %835 = vst [vmem:[#allocation2 + $0x78] sm:$0xff] %v819_v55  ;;  %1816 = vpow2.f32 %v882_v47  ;;  %v1813_v3 = vpop.eup %1812  ;;  %973 = vst [vmem:[#allocation2 + $0xc0] sm:$0xff] %v957_v34  ;;  %v958_v46 = vadd.f32 %v942_v4, %v910_v31  ;;  %v897_v26 = vsub.f32 1.0, %v1811_v45  ;;  %v1222_v15 = vadd.f32 %v1206_v53, %v1158_v40  ;;  %v3257_v56 = vld [vmem:[#allocation33_spill] sm:$0xff]  ;;  %v3258_v4 = vld [vmem:[#allocation26_spill] sm:$0xff] }
 0x12d   : > { %v1094_v57 = vmul.f32 %v2502_v22, %v2502_v22  ;;  %v959_v12 = vadd.f32 %v943_v23, %v911_v2  ;;  %v944_v28 = vmul.f32 %v928_v21, %v2718_v33  ;;  %v929_v61 = vmul.f32 %v896_v48, %v896_v48  ;;  %v3260_v23 = vld [vmem:[#allocation37_spill] sm:$0xff] }
 0x12e   : > { %v898_v24 = vsub.f32 1.0, %v1813_v3  ;;  %974 = vst [vmem:[#allocation2 + $0xc8] sm:$0xff] %v958_v46  ;;  %v930_v38 = vmul.f32 %v897_v26, %v897_v26  ;;  %v1238_v30 = vsub.f32 0.0, %v1222_v15  ;;  %v1127_v6 = vmul.f32 %v1046_v19, %v3253_v7  ;;  %v1111_v3 = vld [vmem:[#allocation2 + $0x108] sm:$0xff]  ;;  %v3261_v46 = vld [vmem:[#allocation16_spill] sm:$0xff] }
 0x12f   : > { %v1143_v29 = vsub.f32 1.0, %v2502_v22  ;;  %975 = vst [vmem:[#allocation2 + $0xd0] sm:$0xff] %v959_v12  ;;  %v960_v59 = vadd.f32 %v944_v28, %v912_v13  ;;  %v945_v40 = vmul.f32 %v929_v61, %v2742_v18  ;;  %v3254_v51 = vsub.f32 1.0, %v3253_v7  ;;  %v3256_v18 = vld [vmem:[#allocation25_spill] sm:$0xff] }
 0x130   : > { %v931_v54 = vmul.f32 %v898_v24, %v898_v24  ;;  %v2885_v20 = vpop.eup %1814  ;;  %v946_v43 = vmul.f32 %v930_v38, %v2794_v32  ;;  %v1254_v9 = vadd.f32 %v1238_v30, %v1110_v60  ;;  %v1191_v27 = vmul.f32 %v1094_v57, %v1094_v57  ;;  %v3263_v30 = vld [vmem:[#allocation17_spill] sm:$0xff] }
 0x131   : > { %v1175_v33 = vmul.f32 %v1078_v36, %v3254_v51  ;;  %v1159_v25 = vmul.f32 %v1143_v29, %v1127_v6  ;;  %976 = vst [vmem:[#allocation2 + $0xd8] sm:$0xff] %v960_v59  ;;  %v961_v55 = vadd.f32 %v945_v40, %v913_v50  ;;  %v1031_v17 = vmin.f32 %v3255_v49, 18.420681  ;;  %v3259_v36 = vld [vmem:[#allocation27_spill] sm:$0xff]  ;;  %v3264_v6 = vld [vmem:[#allocation28_spill] sm:$0xff]  ;;  %v3266_v51 = vld [vmem:[#allocation29_spill] sm:$0xff] }
 0x132   : > { %v947_v22 = vmul.f32 %v931_v54, %v2824_v44  ;;  %v1063_v62 = vmin.f32 %v3256_v18, 18.420681  ;;  %v962_v31 = vadd.f32 %v946_v43, %v914_v16  ;;  %1270 = vst [vmem:[#allocation2 + $0x100] sm:$0xff] %v1254_v9  ;;  %v1095_v47 = vmul.f32 %v3257_v56, %v3257_v56  ;;  %v916_v43 = vld [vmem:[#allocation2 + $0xf8] sm:$0xff]  ;;  %v1112_v49 = vld [vmem:[#allocation2 + $0x110] sm:$0xff] }
 0x133   : > { %v1207_v37 = vmul.f32 %v1191_v27, %v1175_v33  ;;  %v1144_v32 = vsub.f32 1.0, %v3257_v56  ;;  %977 = vst [vmem:[#allocation2 + $0xe0] sm:$0xff] %v961_v55  ;;  %v1047_v42 = vsub.f32 0.0, %v1031_v17  ;;  %v1032_v2 = vmin.f32 %v3258_v4, 18.420681  ;;  %v3267_v27 = vld [vmem:[#allocation38_spill] sm:$0xff] }
 0x134   : > { %v963_v53 = vadd.f32 %v947_v22, %v915_v5  ;;  %v1079_v34 = vsub.f32 0.0, %v1063_v62  ;;  %978 = vst [vmem:[#allocation2 + $0xe8] sm:$0xff] %v962_v31  ;;  %v1192_v19 = vmul.f32 %v1095_v47, %v1095_v47  ;;  %v1064_v45 = vmin.f32 %v3259_v36, 18.420681  ;;  %v1113_v36 = vld [vmem:[#allocation2 + $0x118] sm:$0xff] }
 0x135   : > { %v1223_v44 = vadd.f32 %v1207_v37, %v1159_v25  ;;  %v1096_v21 = vmul.f32 %v3260_v23, %v3260_v23  ;;  %v1128_v13 = vmul.f32 %v1047_v42, %v3261_v46  ;;  %v3262_v26 = vsub.f32 1.0, %v3261_v46  ;;  %v3268_v37 = vld [vmem:[#allocation18_spill] sm:$0xff] }
 0x136   : > { %v1817_v48 = vpop.eup %1816  ;;  %979 = vst [vmem:[#allocation2 + $0xf0] sm:$0xff] %v963_v53  ;;  %v1048_v57 = vsub.f32 0.0, %v1032_v2  ;;  %v1145_v12 = vsub.f32 1.0, %v3260_v23  ;;  %v1080_v24 = vsub.f32 0.0, %v1064_v45  ;;  %v1033_v29 = vmin.f32 %v3264_v6, 18.420681 }
 0x137   : > { %v1176_v15 = vmul.f32 %v1079_v34, %v3262_v26  ;;  %v899_v28 = vsub.f32 1.0, %v1817_v48  ;;  %v1239_v61 = vsub.f32 0.0, %v1223_v44  ;;  %v1193_v60 = vmul.f32 %v1096_v21, %v1096_v21  ;;  %v3271_v44 = vld [vmem:[#allocation31_spill] sm:$0xff]  ;;  %v3277_v6 = vld [vmem:[#allocation44_spill] sm:$0xff] }
 0x138   : > { %v1160_v50 = vmul.f32 %v1144_v32, %v1128_v13  ;;  %v1129_v7 = vmul.f32 %v1048_v57, %v3263_v30  ;;  %v3265_v16 = vsub.f32 1.0, %v3263_v30  ;;  %v1065_v33 = vmin.f32 %v3266_v51, 18.420681  ;;  %v3269_v32 = vld [vmem:[#allocation30_spill] sm:$0xff]  ;;  %v3272_v21 = vld [vmem:[#allocation39_spill] sm:$0xff] }
 0x139   : > { %v1208_v38 = vmul.f32 %v1192_v19, %v1176_v15  ;;  %v932_v59 = vmul.f32 %v899_v28, %v899_v28  ;;  %v1255_v40 = vadd.f32 %v1239_v61, %v1111_v3  ;;  %v1049_v25 = vsub.f32 0.0, %v1033_v29  ;;  %v3273_v15 = vld [vmem:[#allocation19_spill] sm:$0xff]  ;;  %v3274_v28 = vld [vmem:[#allocation34_spill] sm:$0xff] }
 0x13a   : > { %v1177_v54 = vmul.f32 %v1080_v24, %v3265_v16  ;;  %v1161_v9 = vmul.f32 %v1145_v12, %v1129_v7  ;;  %v1097_v55 = vmul.f32 %v3267_v27, %v3267_v27  ;;  %v1081_v18 = vsub.f32 0.0, %v1065_v33  ;;  %v3275_v24 = vld [vmem:[#allocation35_spill] sm:$0xff] }
 0x13b   : > { %v1224_v5 = vadd.f32 %v1208_v38, %v1160_v50  ;;  %v948_v22 = vmul.f32 %v932_v59, %v2864_v14  ;;  %1271 = vst [vmem:[#allocation2 + $0x108] sm:$0xff] %v1255_v40  ;;  %v1146_v62 = vsub.f32 1.0, %v3267_v27  ;;  %v1130_v56 = vmul.f32 %v1049_v25, %v3268_v37  ;;  %v1114_v59 = vld [vmem:[#allocation2 + $0x120] sm:$0xff]  ;;  %v3279_v27 = vld [vmem:[#allocation20_spill] sm:$0xff] }
 0x13c   : > { %v1209_v17 = vmul.f32 %v1193_v60, %v1177_v54  ;;  %v1194_v47 = vmul.f32 %v1097_v55, %v1097_v55  ;;  %v1034_v53 = vmin.f32 %v3269_v32, 18.420681  ;;  %v3270_v4 = vsub.f32 1.0, %v3268_v37  ;;  %v1115_v32 = vld [vmem:[#allocation2 + $0x128] sm:$0xff] }
 0x13d   : > { %v1240_v31 = vsub.f32 0.0, %v1224_v5  ;;  %v964_v42 = vadd.f32 %v948_v22, %v916_v43  ;;  %v1066_v19 = vmin.f32 %v3271_v44, 18.420681  ;;  %v1162_v45 = vmul.f32 %v1146_v62, %v1130_v56  ;;  %v3282_v44 = vld [vmem:[#allocation21_spill] sm:$0xff] }
 0x13e   : > { %v1225_v34 = vadd.f32 %v1209_v17, %v1161_v9  ;;  %v1178_v2 = vmul.f32 %v1081_v18, %v3270_v4  ;;  %v1050_v23 = vsub.f32 0.0, %v1034_v53  ;;  %v1098_v48 = vmul.f32 %v3272_v21, %v3272_v21  ;;  %v3278_v9 = vld [vmem:[#allocation41_spill] sm:$0xff]  ;;  %v3281_v17 = vld [vmem:[#allocation42_spill] sm:$0xff] }
 0x13f   : > { %v1256_v14 = vadd.f32 %v1240_v31, %v1112_v49  ;;  %980 = vst [vmem:[#allocation2 + $0xf8] sm:$0xff] %v964_v42  ;;  %v1082_v13 = vsub.f32 0.0, %v1066_v19  ;;  %v1147_v26 = vsub.f32 1.0, %v3272_v21  ;;  %v1035_v61 = vmin.f32 %v3274_v28, 18.420681 }
 0x140   : > { %v1241_v3 = vsub.f32 0.0, %v1225_v34  ;;  %v1210_v46 = vmul.f32 %v1194_v47, %v1178_v2  ;;  %v1131_v57 = vmul.f32 %v1050_v23, %v3273_v15  ;;  %v1195_v12 = vmul.f32 %v1098_v48, %v1098_v48 }
 0x141   : > { %1272 = vst [vmem:[#allocation2 + $0x110] sm:$0xff] %v1256_v14  ;;  %v1067_v60 = vmin.f32 %v3275_v24, 18.420681  ;;  %v3276_v30 = vsub.f32 1.0, %v3273_v15  ;;  %v1099_v29 = vmul.f32 %v3277_v6, %v3277_v6  ;;  %v1051_v16 = vsub.f32 0.0, %v1035_v61  ;;  %v3285_v24 = vld [vmem:[#allocation22_spill] sm:$0xff] }
 0x142   : > { %v1257_v50 = vadd.f32 %v1241_v3, %v1113_v36  ;;  %v1226_v38 = vadd.f32 %v1210_v46, %v1162_v45  ;;  %v1163_v40 = vmul.f32 %v1147_v26, %v1131_v57  ;;  %v1148_v51 = vsub.f32 1.0, %v3277_v6  ;;  %v3283_v36 = vld [vmem:[#allocation46_spill] sm:$0xff] }
 0x143   : > { %v1179_v7 = vmul.f32 %v1082_v13, %v3276_v30  ;;  %v1083_v54 = vsub.f32 0.0, %v1067_v60  ;;  %v1196_v5 = vmul.f32 %v1099_v29, %v1099_v29  ;;  %v1036_v25 = vmin.f32 %v3278_v9, 18.420681  ;;  %v1116_v13 = vld [vmem:[#allocation2 + $0x130] sm:$0xff] }
 0x144   : > { %1273 = vst [vmem:[#allocation2 + $0x118] sm:$0xff] %v1257_v50  ;;  %v1242_v33 = vsub.f32 0.0, %v1226_v38  ;;  %v1132_v55 = vmul.f32 %v1051_v16, %v3279_v27  ;;  %v3280_v22 = vsub.f32 1.0, %v3279_v27  ;;  %v1068_v18 = vmin.f32 %v3281_v17, 18.420681  ;;  %v3288_v9 = vld [vmem:[#allocation47_spill] sm:$0xff] }
 0x145   : > { %v1211_v43 = vmul.f32 %v1195_v12, %v1179_v7  ;;  %v1100_v62 = vmul.f32 %v2654_v0, %v2654_v0  ;;  %v1052_v56 = vsub.f32 0.0, %v1036_v25  ;;  %v1149_v47 = vsub.f32 1.0, %v2654_v0  ;;  %v3291_v17 = vld [vmem:[#allocation53_spill] sm:$0xff] }
 0x146   : > { %v1180_v49 = vmul.f32 %v1083_v54, %v3280_v22  ;;  %v1258_v31 = vadd.f32 %v1242_v33, %v1114_v59  ;;  %v1164_v53 = vmul.f32 %v1148_v51, %v1132_v55  ;;  %v1084_v34 = vsub.f32 0.0, %v1068_v18 }
 0x147   : > { %v1227_v37 = vadd.f32 %v1211_v43, %v1163_v40  ;;  %v1197_v4 = vmul.f32 %v1100_v62, %v1100_v62  ;;  %v1133_v19 = vmul.f32 %v1052_v56, %v3282_v44  ;;  %v1037_v14 = vmin.f32 %v2637_v39, 18.420681  ;;  %v1117_v40 = vld [vmem:[#allocation2 + $0x138] sm:$0xff]  ;;  %v3287_v43 = vld [vmem:[#allocation23_spill] sm:$0xff] }
 0x148   : > { %v1212_v42 = vmul.f32 %v1196_v5, %v1180_v49  ;;  %1274 = vst [vmem:[#allocation2 + $0x120] sm:$0xff] %v1258_v31  ;;  %v1069_v45 = vmin.f32 %v3283_v36, 18.420681  ;;  %v3284_v21 = vsub.f32 1.0, %v3282_v44  ;;  %v1101_v0 = vmul.f32 %v2720_v8, %v2720_v8  ;;  %v1118_v31 = vld [vmem:[#allocation2 + $0x140] sm:$0xff]  ;;  %v3295_v36 = vld [vmem:[#allocation50_spill] sm:$0xff] }
 0x149   : > { %v1243_v2 = vsub.f32 0.0, %v1227_v37  ;;  %v1150_v3 = vsub.f32 1.0, %v2720_v8  ;;  %v1165_v26 = vmul.f32 %v1149_v47, %v1133_v19  ;;  %v1053_v15 = vsub.f32 0.0, %v1037_v14 }
 0x14a   : > { %v1228_v23 = vadd.f32 %v1212_v42, %v1164_v53  ;;  %v1181_v48 = vmul.f32 %v1084_v34, %v3284_v21  ;;  %v1085_v57 = vsub.f32 0.0, %v1069_v45  ;;  %v1198_v61 = vmul.f32 %v1101_v0, %v1101_v0  ;;  %v3292_v34 = vld [vmem:[#allocation49_spill] sm:$0xff] }
 0x14b   : > { %v1259_v46 = vadd.f32 %v1243_v2, %v1115_v32  ;;  %v1038_v39 = vmin.f32 %v2661_v52, 18.420681  ;;  %v1134_v60 = vmul.f32 %v1053_v15, %v3285_v24  ;;  %v3286_v50 = vsub.f32 1.0, %v3285_v24  ;;  %v3293_v2 = vld [vmem:[#allocation32_spill] sm:$0xff]  ;;  %v3298_v24 = vld [vmem:[#allocation51_spill] sm:$0xff] }
 0x14c   : > { %v1244_v12 = vsub.f32 0.0, %v1228_v23  ;;  %v1213_v28 = vmul.f32 %v1197_v4, %v1181_v48  ;;  %v1070_v30 = vmin.f32 %v2665_v35, 18.420681  ;;  %v1102_v8 = vmul.f32 %v2751_v58, %v2751_v58  ;;  %v3289_v35 = vld [vmem:[#allocation48_spill] sm:$0xff]  ;;  %v3296_v23 = vld [vmem:[#allocation54_spill] sm:$0xff] }
 0x14d   : > { %1275 = vst [vmem:[#allocation2 + $0x128] sm:$0xff] %v1259_v46  ;;  %v1182_v38 = vmul.f32 %v1085_v57, %v3286_v50  ;;  %v1054_v29 = vsub.f32 0.0, %v1038_v39  ;;  %v1151_v59 = vsub.f32 1.0, %v2751_v58  ;;  %v1166_v16 = vmul.f32 %v1150_v3, %v1134_v60  ;;  %v3299_v50 = vld [vmem:[#allocation52_spill] sm:$0xff] }
 0x14e   : > { %v1260_v7 = vadd.f32 %v1244_v12, %v1116_v13  ;;  %v1229_v6 = vadd.f32 %v1213_v28, %v1165_v26  ;;  %v1086_v52 = vsub.f32 0.0, %v1070_v30  ;;  %v1199_v51 = vmul.f32 %v1102_v8, %v1102_v8  ;;  %v1119_v13 = vld [vmem:[#allocation2 + $0x148] sm:$0xff] }
 0x14f   : > { %v1214_v54 = vmul.f32 %v1198_v61, %v1182_v38  ;;  %v1135_v5 = vmul.f32 %v1054_v29, %v3287_v43  ;;  %v1039_v25 = vmin.f32 %v3288_v9, 18.420681  ;;  %v1071_v27 = vmin.f32 %v3289_v35, 18.420681  ;;  %v3297_v61 = vld [vmem:[#allocation36_spill] sm:$0xff]  ;;  %v3302_v9 = vld [vmem:[#allocation55_spill] sm:$0xff] }
 0x150   : > { %1276 = vst [vmem:[#allocation2 + $0x130] sm:$0xff] %v1260_v7  ;;  %v1245_v33 = vsub.f32 0.0, %v1229_v6  ;;  %v3290_v22 = vsub.f32 1.0, %v3287_v43  ;;  %v1103_v58 = vmul.f32 %v3291_v17, %v3291_v17  ;;  %v1152_v18 = vsub.f32 1.0, %v3291_v17  ;;  %v3301_v6 = vld [vmem:[#allocation57_spill] sm:$0xff]  ;;  %v3303_v35 = vld [vmem:[#allocation40_spill] sm:$0xff] }
 0x151   : > { %v1230_v55 = vadd.f32 %v1214_v54, %v1166_v16  ;;  %v1167_v37 = vmul.f32 %v1151_v59, %v1135_v5  ;;  %v1055_v56 = vsub.f32 0.0, %v1039_v25  ;;  %v1087_v47 = vsub.f32 0.0, %v1071_v27  ;;  %v1120_v16 = vld [vmem:[#allocation2 + $0x150] sm:$0xff] }
 0x152   : > { %v1183_v49 = vmul.f32 %v1086_v52, %v3290_v22  ;;  %v1261_v62 = vadd.f32 %v1245_v33, %v1117_v40  ;;  %v1200_v42 = vmul.f32 %v1103_v58, %v1103_v58  ;;  %v1040_v4 = vmin.f32 %v3292_v34, 18.420681 }
 0x153   : > { %v1246_v32 = vsub.f32 0.0, %v1230_v55  ;;  %v1136_v44 = vmul.f32 %v1055_v56, %v3293_v2  ;;  %v3294_v19 = vsub.f32 1.0, %v3293_v2  ;;  %v1072_v45 = vmin.f32 %v3295_v36, 18.420681  ;;  %v1121_v56 = vld [vmem:[#allocation2 + $0x158] sm:$0xff] }
 0x154   : > { %v1215_v53 = vmul.f32 %v1199_v51, %v1183_v49  ;;  %1277 = vst [vmem:[#allocation2 + $0x138] sm:$0xff] %v1261_v62  ;;  %v1104_v21 = vmul.f32 %v3296_v23, %v3296_v23  ;;  %v1056_v3 = vsub.f32 0.0, %v1040_v4  ;;  %v1153_v46 = vsub.f32 1.0, %v3296_v23  ;;  %v3305_v49 = vld [vmem:[#allocation56_spill] sm:$0xff]  ;;  %v3306_v4 = vld [vmem:[#allocation43_spill] sm:$0xff] }
 0x155   : > { %v1184_v14 = vmul.f32 %v1087_v47, %v3294_v19  ;;  %v1262_v48 = vadd.f32 %v1246_v32, %v1118_v31  ;;  %v1168_v26 = vmul.f32 %v1152_v18, %v1136_v44  ;;  %v1088_v57 = vsub.f32 0.0, %v1072_v45  ;;  %v3307_v44 = vld [vmem:[#allocation58_spill] sm:$0xff] }
 0x156   : > { %v1231_v0 = vadd.f32 %v1215_v53, %v1167_v37  ;;  %v1201_v12 = vmul.f32 %v1104_v21, %v1104_v21  ;;  %v1137_v39 = vmul.f32 %v1056_v3, %v3297_v61  ;;  %v1041_v60 = vmin.f32 %v3298_v24, 18.420681  ;;  %v1122_v3 = vld [vmem:[#allocation2 + $0x160] sm:$0xff] }
 0x157   : > { %v1216_v15 = vmul.f32 %v1200_v42, %v1184_v14  ;;  %1278 = vst [vmem:[#allocation2 + $0x140] sm:$0xff] %v1262_v48  ;;  %v1073_v38 = vmin.f32 %v3299_v50, 18.420681  ;;  %v3300_v8 = vsub.f32 1.0, %v3297_v61  ;;  %v1105_v29 = vmul.f32 %v3301_v6, %v3301_v6  ;;  %v3308_v14 = vld [vmem:[#allocation59_spill] sm:$0xff]  ;;  %v3310_v61 = vld [vmem:[#allocation45_spill] sm:$0xff] }
 0x158   : > { %v1247_v28 = vsub.f32 0.0, %v1231_v0  ;;  %v1154_v59 = vsub.f32 1.0, %v3301_v6  ;;  %v1169_v54 = vmul.f32 %v1153_v46, %v1137_v39  ;;  %v1057_v52 = vsub.f32 0.0, %v1041_v60  ;;  %v1123_v6 = vld [vmem:[#allocation2 + $0x168] sm:$0xff] }
 0x159   : > { %v1232_v30 = vadd.f32 %v1216_v15, %v1168_v26  ;;  %v1185_v7 = vmul.f32 %v1088_v57, %v3300_v8  ;;  %v1089_v51 = vsub.f32 0.0, %v1073_v38  ;;  %v1202_v5 = vmul.f32 %v1105_v29, %v1105_v29 }
 0x15a   : > { %v1263_v40 = vadd.f32 %v1247_v28, %v1119_v13  ;;  %v1042_v25 = vmin.f32 %v3302_v9, 18.420681  ;;  %v1138_v27 = vmul.f32 %v1057_v52, %v3303_v35  ;;  %v3304_v55 = vsub.f32 1.0, %v3303_v35 }
 0x15b   : > { %v1248_v33 = vsub.f32 0.0, %v1232_v30  ;;  %v1217_v43 = vmul.f32 %v1201_v12, %v1185_v7  ;;  %v1074_v17 = vmin.f32 %v3305_v49, 18.420681  ;;  %v1106_v58 = vmul.f32 %v2830_v11, %v2830_v11 }
 0x15c   : > { %1279 = vst [vmem:[#allocation2 + $0x148] sm:$0xff] %v1263_v40  ;;  %v1186_v22 = vmul.f32 %v1089_v51, %v3304_v55  ;;  %v1058_v31 = vsub.f32 0.0, %v1042_v25  ;;  %v1155_v37 = vsub.f32 1.0, %v2830_v11  ;;  %v1170_v47 = vmul.f32 %v1154_v59, %v1138_v27  ;;  %v1125_v27 = vld [vmem:[#allocation2 + $0x178] sm:$0xff] }
 0x15d   : > { %v1264_v18 = vadd.f32 %v1248_v33, %v1120_v16  ;;  %v1233_v62 = vadd.f32 %v1217_v43, %v1169_v54  ;;  %v1090_v53 = vsub.f32 0.0, %v1074_v17  ;;  %v1203_v42 = vmul.f32 %v1106_v58, %v1106_v58  ;;  %v1124_v43 = vld [vmem:[#allocation2 + $0x170] sm:$0xff] }
 0x15e   : > { %v1218_v32 = vmul.f32 %v1202_v5, %v1186_v22  ;;  %v1139_v2 = vmul.f32 %v1058_v31, %v3306_v4  ;;  %v1043_v19 = vmin.f32 %v3307_v44, 18.420681  ;;  %v1075_v36 = vmin.f32 %v3308_v14, 18.420681 }
 0x15f   : > { %1280 = vst [vmem:[#allocation2 + $0x150] sm:$0xff] %v1264_v18  ;;  %v1249_v34 = vsub.f32 0.0, %v1233_v62  ;;  %v3309_v23 = vsub.f32 1.0, %v3306_v4  ;;  %v1107_v11 = vmul.f32 %v2852_v1, %v2852_v1  ;;  %v1156_v48 = vsub.f32 1.0, %v2852_v1 }
 0x160   : > { %v1234_v45 = vadd.f32 %v1218_v32, %v1170_v47  ;;  %v1171_v46 = vmul.f32 %v1155_v37, %v1139_v2  ;;  %v1059_v13 = vsub.f32 0.0, %v1043_v19  ;;  %v1091_v26 = vsub.f32 0.0, %v1075_v36 }
 0x161   : > { %v1187_v21 = vmul.f32 %v1090_v53, %v3309_v23  ;;  %v1265_v0 = vadd.f32 %v1249_v34, %v1121_v56  ;;  %v1204_v12 = vmul.f32 %v1107_v11, %v1107_v11  ;;  %v1044_v28 = vmin.f32 %v2846_v63, 18.420681 }
 0x162   : > { %v1250_v15 = vsub.f32 0.0, %v1234_v45  ;;  %v1140_v39 = vmul.f32 %v1059_v13, %v3310_v61  ;;  %v3311_v24 = vsub.f32 1.0, %v3310_v61  ;;  %v1076_v50 = vmin.f32 %v2850_v10, 18.420681 }
 0x163   : > { %v1219_v57 = vmul.f32 %v1203_v42, %v1187_v21  ;;  %1281 = vst [vmem:[#allocation2 + $0x158] sm:$0xff] %v1265_v0  ;;  %v1108_v1 = vmul.f32 %v2885_v20, %v2885_v20  ;;  %v1060_v8 = vsub.f32 0.0, %v1044_v28  ;;  %v1157_v7 = vsub.f32 1.0, %v2885_v20 }
 0x164   : > { %v1188_v60 = vmul.f32 %v1091_v26, %v3311_v24  ;;  %v1266_v38 = vadd.f32 %v1250_v15, %v1122_v3  ;;  %v1172_v29 = vmul.f32 %v1156_v48, %v1140_v39  ;;  %v1092_v63 = vsub.f32 0.0, %v1076_v50 }
 0x165   : > { %v1235_v30 = vadd.f32 %v1219_v57, %v1171_v46  ;;  %v1205_v40 = vmul.f32 %v1108_v1, %v1108_v1  ;;  %v1141_v54 = vmul.f32 %v1060_v8, %v2673_v41  ;;  %v3312_v10 = vsub.f32 1.0, %v2673_v41 }
 0x166   : > { %v1220_v59 = vmul.f32 %v1204_v12, %v1188_v60  ;;  %1282 = vst [vmem:[#allocation2 + $0x160] sm:$0xff] %v1266_v38 }
 0x167   : > { %v1251_v16 = vsub.f32 0.0, %v1235_v30  ;;  %v1189_v51 = vmul.f32 %v1092_v63, %v3312_v10  ;;  %v1173_v5 = vmul.f32 %v1157_v7, %v1141_v54 }
 0x168   : > { %v1236_v52 = vadd.f32 %v1220_v59, %v1172_v29 }
 0x169   : > { %v1267_v33 = vadd.f32 %v1251_v16, %v1123_v6  ;;  %v1221_v25 = vmul.f32 %v1205_v40, %v1189_v51 }
 0x16a   : > { %v1252_v9 = vsub.f32 0.0, %v1236_v52 }
 0x16b   : > { %1283 = vst [vmem:[#allocation2 + $0x168] sm:$0xff] %v1267_v33  ;;  %v1237_v35 = vadd.f32 %v1221_v25, %v1173_v5 }
 0x16c   : > { %v1268_v20 = vadd.f32 %v1252_v9, %v1124_v43 }
 0x16d   : > { %v1253_v55 = vsub.f32 0.0, %v1237_v35 }
 0x16e   : > { %1284 = vst [vmem:[#allocation2 + $0x170] sm:$0xff] %v1268_v20 }
 0x16f   : > { %v1269_v22 = vadd.f32 %v1253_v55, %v1125_v27 }
 0x171   : > { %1285 = vst [vmem:[#allocation2 + $0x178] sm:$0xff] %v1269_v22 }
 0x172 PF: > { %v1376_v49 = vld [vmem:[#allocation2 + $0x100] sm:$0xff]  ;;  %v1377_v17 = vld [vmem:[#allocation2 + $0x108] sm:$0xff]  ;;  %v1378_v58 = vld [vmem:[#allocation2 + $0x110] sm:$0xff]  ;;  %s1580_s11 = smul.u32 384, %s2009_s17  ;;  %s1433_s22 = sshll.u32 %s2237_s20, 4  ;;  %s3010_s22 = int_to_ptr.vmem [resolvable:$true] %s1433_s22 }
 0x173   : > { %v1392_v18 = vadd.f32 %v1377_v17, %v1376_v49  ;;  %v1379_v41 = vld [vmem:[#allocation2 + $0x118] sm:$0xff]  ;;  %v1380_v31 = vld [vmem:[#allocation2 + $0x120] sm:$0xff]  ;;  %v1290_v47 = vld [vmem:[#allocation2 + $0x8] sm:$0xff]  ;;  %s3016_s17 = scalar_lea.sflag [#allocation5], %s272_s26  ;;  %s1906_s15 = scalar_lea.vmem %s3010_s22, 384 }
 0x174   : > { %v1289_v56 = vld [vmem:[#allocation2] sm:$0xff]  ;;  %v1381_v32 = vld [vmem:[#allocation2 + $0x128] sm:$0xff]  ;;  %v1291_v53 = vld [vmem:[#allocation2 + $0x10] sm:$0xff]  ;;  %s3008_s2 = scalar_lea.hbm %s3071_s3, %s1580_s11  ;;  %p1907_p2 = scmp.ne.s32.totalorder %s3010_s22, %s1906_s15 }
 0x175   : > { %v1393_v62 = vadd.f32 %v1392_v18, %v1378_v58  ;;  %v1305_v42 = vadd.f32 %v1290_v47, %v1289_v56  ;;  %v1292_v4 = vld [vmem:[#allocation2 + $0x18] sm:$0xff]  ;;  %v1382_v2 = vld [vmem:[#allocation2 + $0x130] sm:$0xff]  ;;  %v1293_v14 = vld [vmem:[#allocation2 + $0x20] sm:$0xff]  ;;  %p3313_p1 = scmp.ne.s32.totalorder %s3141_s24, 0  ;;  %s2027_s21 = smov [#allocation9]  }
 0x176   : > { %v1383_v36 = vld [vmem:[#allocation2 + $0x138] sm:$0xff]  ;;  %v1332_v23 = vld [vmem:[#allocation2 + $0x80] sm:$0xff]  ;;  %v1294_v11 = vld [vmem:[#allocation2 + $0x28] sm:$0xff]  ;;  %s1910_s27 = sshll.u32 %s2027_s21, 4  ;;  %s1911_s27 = int_to_ptr.vmem [resolvable:$false] %s1910_s27 }
 0x177   : > { %v1394_v37 = vadd.f32 %v1393_v62, %v1379_v41  ;;  %v1306_v44 = vadd.f32 %v1305_v42, %v1291_v53  ;;  %v1333_v48 = vld [vmem:[#allocation2 + $0x88] sm:$0xff]  ;;  %v1334_v0 = vld [vmem:[#allocation2 + $0x90] sm:$0xff]  ;;  %v1384_v3 = vld [vmem:[#allocation2 + $0x140] sm:$0xff]  ;;  %p1908_p3 = pnand %p1907_p2, %p3313_p1  ;;  %s1912_s4 = scalar_lea.vmem %s1911_s27, 768 }
 0x178   : > { %v1348_v13 = vadd.f32 %v1333_v48, %v1332_v23  ;;  %v1295_v15 = vld [vmem:[#allocation2 + $0x30] sm:$0xff]  ;;  %v1335_v57 = vld [vmem:[#allocation2 + $0x98] sm:$0xff]  ;;  %v1385_v12 = vld [vmem:[#allocation2 + $0x148] sm:$0xff]  ;;  %p1913_p9 = scmp.lt.s32.totalorder %s3010_s22, %s1911_s27  ;;  %p1914_p0 = scmp.lt.s32.totalorder %s1912_s4, %s1906_s15 }
 0x179   : > { %v1395_v34 = vadd.f32 %v1394_v37, %v1380_v31  ;;  %v1307_v45 = vadd.f32 %v1306_v44, %v1292_v4  ;;  %v1296_v24 = vld [vmem:[#allocation2 + $0x38] sm:$0xff]  ;;  %v1336_v60 = vld [vmem:[#allocation2 + $0xa0] sm:$0xff]  ;;  %v1386_v50 = vld [vmem:[#allocation2 + $0x150] sm:$0xff]  ;;  %p1909_p7 = pneg %p1908_p3 }
 0x17a   : > { %v1349_v61 = vadd.f32 %v1348_v13, %v1334_v0  ;;  %v1297_v8 = vld [vmem:[#allocation2 + $0x40] sm:$0xff]  ;;  %v1337_v7 = vld [vmem:[#allocation2 + $0xa8] sm:$0xff]  ;;  %v1387_v6 = vld [vmem:[#allocation2 + $0x158] sm:$0xff]  ;;  %p1915_p5 = por %p1914_p0, %p1913_p9 }
 0x17b   : > { %v1396_v19 = vadd.f32 %v1395_v34, %v1381_v32  ;;  %v1308_v46 = vadd.f32 %v1307_v45, %v1293_v14  ;;  %v1298_v40 = vld [vmem:[#allocation2 + $0x48] sm:$0xff]  ;;  %v1338_v16 = vld [vmem:[#allocation2 + $0xb0] sm:$0xff]  ;;  %v1388_v54 = vld [vmem:[#allocation2 + $0x160] sm:$0xff] }
 0x17c   : > { %v1350_v38 = vadd.f32 %v1349_v61, %v1335_v57  ;;  %v1299_v33 = vld [vmem:[#allocation2 + $0x50] sm:$0xff]  ;;  %v1339_v43 = vld [vmem:[#allocation2 + $0xb8] sm:$0xff]  ;;  %v1389_v5 = vld [vmem:[#allocation2 + $0x168] sm:$0xff]  ;;  %p1916_p6 = pnand %p1915_p5, %p1909_p7 }
 0x17d   : > { %v1397_v21 = vadd.f32 %v1396_v19, %v1382_v2  ;;  %v1309_v28 = vadd.f32 %v1308_v46, %v1294_v11  ;;  %v1300_v35 = vld [vmem:[#allocation2 + $0x58] sm:$0xff]  ;;  %v1340_v27 = vld [vmem:[#allocation2 + $0xc0] sm:$0xff]  ;;  %v1390_v55 = vld [vmem:[#allocation2 + $0x170] sm:$0xff] }
 0x17e   : > { %v1351_v59 = vadd.f32 %v1350_v38, %v1336_v60  ;;  %v1301_v58 = vld [vmem:[#allocation2 + $0x60] sm:$0xff]  ;;  %v1341_v18 = vld [vmem:[#allocation2 + $0xc8] sm:$0xff]  ;;  %v1391_v41 = vld [vmem:[#allocation2 + $0x178] sm:$0xff] }
 0x17f   : > { %v1398_v26 = vadd.f32 %v1397_v21, %v1383_v36  ;;  %v1310_v1 = vadd.f32 %v1309_v28, %v1295_v15  ;;  %v1302_v56 = vld [vmem:[#allocation2 + $0x68] sm:$0xff]  ;;  %v1342_v47 = vld [vmem:[#allocation2 + $0xd0] sm:$0xff]  ;;  %v1343_v4 = vld [vmem:[#allocation2 + $0xd8] sm:$0xff] }
 0x180   : > { %v1352_v10 = vadd.f32 %v1351_v59, %v1337_v7  ;;  %v1303_v34 = vld [vmem:[#allocation2 + $0x70] sm:$0xff]  ;;  %v1304_v19 = vld [vmem:[#allocation2 + $0x78] sm:$0xff]  ;;  %v1344_v14 = vld [vmem:[#allocation2 + $0xe0] sm:$0xff] }
 0x181   : > { %v1399_v39 = vadd.f32 %v1398_v26, %v1384_v3  ;;  %v1311_v29 = vadd.f32 %v1310_v1, %v1296_v24  ;;  %v1345_v23 = vld [vmem:[#allocation2 + $0xe8] sm:$0xff]  ;;  %v1346_v48 = vld [vmem:[#allocation2 + $0xf0] sm:$0xff]  ;;  %v1347_v3 = vld [vmem:[#allocation2 + $0xf8] sm:$0xff] }
 0x182   : > { %v1353_v25 = vadd.f32 %v1352_v10, %v1338_v16 }
 0x183   : > { %v1400_v30 = vadd.f32 %v1399_v39, %v1385_v12  ;;  %v1312_v52 = vadd.f32 %v1311_v29, %v1297_v8 }
 0x184   : > { %v1354_v49 = vadd.f32 %v1353_v25, %v1339_v43 }
 0x185   : > { %v1401_v63 = vadd.f32 %v1400_v30, %v1386_v50  ;;  %v1313_v9 = vadd.f32 %v1312_v52, %v1298_v40 }
 0x186   : > { %v1355_v31 = vadd.f32 %v1354_v49, %v1340_v27 }
 0x187   : > { %v1402_v51 = vadd.f32 %v1401_v63, %v1387_v6  ;;  %v1314_v22 = vadd.f32 %v1313_v9, %v1299_v33 }
 0x188   : > { %v1356_v53 = vadd.f32 %v1355_v31, %v1341_v18 }
 0x189   : > { %v1403_v20 = vadd.f32 %v1402_v51, %v1388_v54  ;;  %v1315_v62 = vadd.f32 %v1314_v22, %v1300_v35 }
 0x18a   : > { %v1357_v44 = vadd.f32 %v1356_v53, %v1342_v47 }
 0x18b   : > { %v1404_v17 = vadd.f32 %v1403_v20, %v1389_v5  ;;  %v1316_v32 = vadd.f32 %v1315_v62, %v1301_v58 }
 0x18c   : > { %v1358_v45 = vadd.f32 %v1357_v44, %v1343_v4 }
 0x18d   : > { %v1405_v37 = vadd.f32 %v1404_v17, %v1390_v55  ;;  %v1317_v2 = vadd.f32 %v1316_v32, %v1302_v56 }
 0x18e   : > { %v1359_v11 = vadd.f32 %v1358_v45, %v1344_v14 }
 0x18f   : > { %v1406_v42 = vadd.f32 %v1405_v37, %v1391_v41  ;;  %v1318_v36 = vadd.f32 %v1317_v2, %v1303_v34 }
 0x190   : > { %v1360_v0 = vadd.f32 %v1359_v11, %v1345_v23 }
 0x191   : > { %1407 = vadd.xlane.f32.xlu1 %v1406_v42  ;;  %v1319_v21 = vadd.f32 %v1318_v36, %v1304_v19 }
 0x192   : > { %v1361_v46 = vadd.f32 %v1360_v0, %v1346_v48 }
 0x193   : > { %1320 = vadd.xlane.f32.xlu0 %v1319_v21 }
 0x194   : > { %v1362_v13 = vadd.f32 %v1361_v46, %v1347_v3 }
 0x197   : > { %1363 = vadd.xlane.f32.xlu0 %v1362_v13 }
 0x21e   : > { %v1408_v26 = vpop.xlane.xlu1 %1407 }
 0x21f   : > { %v1409_v15 = vrot.slane %v1408_v26, 4 }
 0x220   : > { %v1321_v57 = vpop.xlane.xlu0 %1320 }
 0x221   : > { %v1322_v12 = vrot.slane %v1321_v57, 4  ;;  %v1410_v28 = vadd.f32 %v1409_v15, %v1408_v26 }
 0x223   : > { %v1323_v61 = vadd.f32 %v1322_v12, %v1321_v57  ;;  %v1411_v24 = vrot.slane %v1410_v28, 2 }
 0x224   : > { %v1364_v60 = vpop.xlane.xlu0 %1363 }
 0x225   : > { %v1324_v39 = vrot.slane %v1323_v61, 2  ;;  %v1365_v50 = vrot.slane %v1364_v60, 4  ;;  %v1412_v8 = vadd.f32 %v1411_v24, %v1410_v28 }
 0x227   : > { %v1325_v1 = vadd.f32 %v1324_v39, %v1323_v61  ;;  %v1366_v38 = vadd.f32 %v1365_v50, %v1364_v60  ;;  %v1413_v59 = vrot.slane %v1412_v8, 1 }
 0x229   : > { %v1326_v30 = vrot.slane %v1325_v1, 1  ;;  %v1367_v7 = vrot.slane %v1366_v38, 2  ;;  %v1414_v16 = vadd.f32 %v1413_v59, %v1412_v8 }
 0x22b   : > { %v1327_v6 = vadd.f32 %v1326_v30, %v1325_v1  ;;  %v1368_v29 = vadd.f32 %v1367_v7, %v1366_v38 }
 0x22d   : > { %1574 = vpush %v1327_v6  ;;  %v1369_v63 = vrot.slane %v1368_v29, 1 }
 0x22f   : > { %v1370_v40 = vadd.f32 %v1369_v63, %v1368_v29 }
 0x231   : > { %1576 = vpush %v1370_v40 }
 0x232   : > { %1578 = vpush %v1414_v16 }
 0x25e   : > { %s1575_s23 = spop %1574 }
 0x25f   : > { %v1329_v54 = vstv %s1575_s23 }
 0x260   : > { %1330 = vst [vmem:[%s2237_s20] sm:$0xff] %v1329_v54 }
 0x262   : > { %s1577_s30 = spop %1576 }
 0x263   : > { %v1372_v52 = vstv %s1577_s30  ;;  %s1579_s10 = spop %1578 }
 0x264   : > { %1564 = vst [vmem:[%s2237_s20 + $0x8] sm:$0xff] %v1372_v52  ;;  %v1416_v10 = vstv %s1579_s10 }
 0x265   : > { %1565 = vst [vmem:[%s2237_s20 + $0x10] sm:$0xff] %v1416_v10 }
 0x266   : > { %1919 = shalt.err (!%p1916_p6)
}
 0x267   : > { %s1920_s29 = scalar_lea.hbm %s3008_s2, 384  ;;  %s1924_s26 = scalar_lea.hbm %s3071_s3, 768 }
 0x268   : > { %p1921_p8 = scmp.ne.s32.totalorder %s3008_s2, %s1920_s29  ;;  %p1925_p11 = scmp.lt.u32.totalorder %s3008_s2, %s3071_s3 }
 0x269   : > { %p1926_p12 = scmp.lt.u32.totalorder %s1924_s26, %s1920_s29  ;;  %p1928_p2 = scmp.lt.u32.totalorder %s1920_s29, %s3008_s2 }
 0x26a   : > { %p1922_p10 = pnand %p1921_p8, %p3313_p1 }
 0x26b   : > { %p1927_p13 = por %p1926_p12, %p1925_p11 }
 0x26c   : > { %p1923_p4 = pneg %p1922_p10 }
 0x26d   : > { %p1929_p3 = por %p1928_p2, %p1927_p13 }
 0x26f   : > { %p1930_p7 = pnand %p1929_p3, %p1923_p4 }
 0x271   : > { %1933 = shalt.err (!%p1930_p7)
}
 0x272   : > { %s2028_s23 = smov 128   ;;  %s2029_s11 = smov 8  }
 0x273   : > { %1589 = dma.vmem_to_hbm [thread:$0]  (%p3313_p1), %s3010_s22, 384, %s3008_s2, %s3016_s17, %s2028_s23, %s2028_s23, %s2029_s11  }
 0x274 PF: > { %s1448_s8 = sand.u32 1, %s1989_s12   ;;  %p3314_p9 = scmp.ne.s32.totalorder %s3142_s25, 0 }
 0x275   : > { %p3315_p0 = scmp.ge.s32.totalorder %s2017_s19, 2  ;;  %s1449_s9 = scalar_lea.sflag [#allocation5], %s1448_s8 }
 0x277   : > { %p1603_p5 = pnand %p3315_p0, %p3314_p9 }
 0x279   : > { %1983 = dma.done.wait (!%p1603_p5), %s1449_s9, 384  }
 0x27a   : > { %1985 = vsyncadd (!%p1603_p5), %s1449_s9, 4294966912  ;;  %s22_s19 = sadd.s32 1, %s2017_s19   ;;  %s3316_s24 = sld [smem:[#allocation14_spill]] }
 0x27b   : > { %p19_p6 = scmp.ge.s32.totalorder %s22_s19, 4   ;;  %s3317_s12 = smov %s1993_s13 }
 0x27c   : > { %s3318_s13 = smov %s1997_s14  ;;  %s3319_s14 = smov %s2156_s6 }
 0x27d   : > { %s3320_s15 = smov %s2005_s16  ;;  %s3058_s16 = smov 0  }
 0x27e   : > { %s3321_s17 = smov %s2013_s18  ;;  %21 = sbr.rel (!%p19_p6) target bundleno = 11 (0xb), region = 112 }
 0x280   : > { %s3322_s18 = smov %s3316_s24 }
 0x285   :  { %1454 = vsyncpa [#allocation4], 1 }
 0x286   :  { %1456 = vsyncpa [#allocation4 + $0x1], 1 }
 0x287   :  { %1457 = vsyncpa [#allocation7], 1 }
 0x288   :  { %1459 = vsyncpa [#allocation7 + $0x1], 1 }
 0x289   :  { %1460 = vsyncpa [#allocation5], 1 }
 0x28a   :  { %1462 = vsyncpa [#allocation5 + $0x1], 1 }

</bundles_post_ra>
